<compile_context>
chip_gen: v7x
topology: tpu7x:2x2x1
jax: 0.10.0
libtpu: 0.0.40
codegen_flags: <defaults>
</compile_context>

<pallas_src>
import jax
import jax.numpy as jnp
from jax import lax
from jax.experimental import pallas as pl
from jax.experimental.pallas import tpu as pltpu

TOPK = 20
BERT_SIZE = 300   # embedding dim, as in the PyTorch module
_EPS = 1e-12      # F.normalize eps
_INV_EPS = 1e12   # 1 / max(norm, eps) == min(rsqrt(sumsq), 1/eps)
_NEG = -3.0e38    # finite "minus infinity" sentinel (keeps padded rows NaN-free)


def _round_up(x, m):
    return ((x + m - 1) // m) * m


def _make_kernel(l_true, l_pad, r_len):
    """Kernel factory closing over static sizes (true / padded query len, doc len)."""

    def kernel(q_ref, d_ref, w_att_ref, scal_ref, o_ref):
        # q_ref: (Bt, L_pad, D) raw query reps (rows l >= l_true are zero padding)
        # d_ref: (Bt, R, D) raw doc reps
        # w_att_ref: (1, D) attention weight row (Linear(D, 1, bias=False))
        # scal_ref (SMEM, (TOPK+1,)): [w_out*w_lin[0..TOPK-1], w_out*b_lin + b_out]
        # o_ref: (Bt, 1, 1)
        q = q_ref[...]
        d = d_ref[...]
        bt = q.shape[0]
        n = bt * l_pad

        # --- cosine normalization before the matmul (same as F.normalize) ---
        #   1/max(||x||, eps) == min(rsqrt(sum(x^2)), 1/eps); lane reduce + EUP rsqrt,
        #   no degenerate MXU matmul for ||d||^2.
        inv_q = jnp.minimum(
            lax.rsqrt(jnp.sum(q * q, axis=-1, keepdims=True)), _INV_EPS)   # (Bt, L, 1)
        inv_d = jnp.minimum(
            lax.rsqrt(jnp.sum(d * d, axis=-1, keepdims=True)), _INV_EPS)   # (Bt, R, 1)
        qn = q * inv_q
        dn = d * inv_d

        # --- matching matrix on the MXU: einsum('bld,brd->blr') ---
        matching = lax.dot_general(
            qn, dn, dimension_numbers=(((2,), (2,)), ((0,), (0,))),
            preferred_element_type=jnp.float32)                            # (Bt, L_pad, R)

        # --- relayout for the top-k phase: (Bt, L_pad, R) -> (R, Bt*L_pad) ---
        # The reshape is layout-free (l_pad % 8 == 0); the single 2-D transpose puts
        # the reduction axis R on sublanes and Bt*L_pad lane-dense.
        m0 = jnp.transpose(matching.reshape(n, r_len))                     # (R, N)

        # --- top-k (descending, first-occurrence tie-break like torch.topk),
        #     fused with Linear(TOPK, 1) whose weights are pre-scaled by w_out ---
        # TODO(synk): assumes R > TOPK (true here); with R <= TOPK the later slots
        # pick the finite -3e38 sentinel (torch.topk would error instead).
        row = lax.broadcasted_iota(jnp.int32, (r_len, 1), 0).astype(jnp.float32)
        r_sentinel = jnp.float32(r_len)

        def body(k, carry):
            mvals, dense = carry
            mx = jnp.max(mvals, axis=0, keepdims=True)                     # (1, N)
            dense = dense + mx * scal_ref[k]
            is_max = mvals == mx
            first = jnp.min(jnp.where(is_max, row, r_sentinel),
                            axis=0, keepdims=True)                         # (1, N)
            mvals = jnp.where(row == first, _NEG, mvals)
            return mvals, dense

        _, dense = lax.fori_loop(
            0, TOPK, body, (m0, jnp.zeros((1, n), jnp.float32)), unroll=True)

        # back to the (Bt, L_pad, 1) layout via a cheap, tile-aligned (8, N) transpose
        dense8 = jnp.broadcast_to(dense, (8, n))
        dense_bl = jnp.transpose(dense8)[:, 0:1].reshape(bt, l_pad, 1)     # (Bt, L_pad, 1)

        # --- attention over query tokens (uses the RAW reps, like the module) ---
        att_logits = jnp.sum(q * w_att_ref[...], axis=-1, keepdims=True)   # (Bt, L_pad, 1)
        if l_pad != l_true:   # mask zero-padded query positions out of the softmax
            lpos = lax.broadcasted_iota(jnp.int32, (bt, l_pad, 1), 1)
            att_logits = jnp.where(lpos < l_true, att_logits, _NEG)
        att_max = jnp.max(att_logits, axis=1, keepdims=True)
        att_exp = jnp.exp(att_logits - att_max)
        denom = jnp.sum(att_exp, axis=1, keepdims=True)                    # (Bt, 1, 1)
        att = att_exp * pl.reciprocal(denom, approx=True)

        # einsum('bl,bl->b') plus the folded Linear(1,1) affine tail
        embed = jnp.sum(dense_bl * att, axis=1, keepdims=True)             # (Bt, 1, 1)
        o_ref[...] = embed + scal_ref[TOPK]

    return kernel


def drmmtks_forward(q_reps, d_reps, w_att, w_lin, b_lin, w_out, b_out,
                    *, batch_tile=None):
    q_reps = jnp.asarray(q_reps, jnp.float32)
    d_reps = jnp.asarray(d_reps, jnp.float32)
    B, L, D = q_reps.shape
    R = d_reps.shape[1]

    # pad query length to a sublane multiple so the in-kernel (Bt,L,R)->(Bt*L,R)
    # reshape is layout-free; padded rows are masked out of the softmax in-kernel.
    l_pad = _round_up(L, 8)
    if l_pad != L:
        q_reps = jnp.pad(q_reps, ((0, 0), (0, l_pad - L), (0, 0)))

    # --- VMEM-aware tile sizing (per-generation capacity, lane padding included) ---
    try:
        vmem_phys = int(pltpu.get_tpu_info().vmem_capacity_bytes)
    except Exception:
        vmem_phys = 64 << 20                       # conservative (v7x-sized) fallback
    vmem_limit = int(min(vmem_phys * 3 // 4, 64 << 20))

    d_lane = _round_up(D, 128)
    r_sub = _round_up(R, 8)
    per_elem = 4 * (3 * l_pad * d_lane             # q: 2 pipeline buffers + normalized copy
                    + 3 * r_sub * d_lane           # d: 2 pipeline buffers + normalized copy
                    + 2 * l_pad * _round_up(R, 128)  # matching matrix (+ slack)
                    + 4 * r_sub * l_pad)           # transposed copy + top-k temporaries
    budget = vmem_limit // 2                       # keep half the limit as headroom
    if batch_tile is None:
        bt = max(1, min(B, budget // per_elem))
        if B >= 2:                                 # >=2 grid steps: both TCs (v7x) get work
            bt = min(bt, pl.cdiv(B, 2))
        if B >= 64:                                # >=4 steps for pipeline depth
            bt = min(bt, pl.cdiv(B, 4))
        if 128 % l_pad == 0:                       # lane-dense flat layout: Bt*L % 128 == 0
            step = 128 // l_pad
            if bt >= step:
                bt = (bt // step) * step
    else:
        bt = int(batch_tile)
    bt = int(max(1, bt))

    n_tiles = int(pl.cdiv(B, bt))
    B_pad = n_tiles * bt
    if B_pad != B:   # zero batch padding is benign: clamped rsqrt keeps everything finite
        q_reps = jnp.pad(q_reps, ((0, B_pad - B), (0, 0), (0, 0)))
        d_reps = jnp.pad(d_reps, ((0, B_pad - B), (0, 0), (0, 0)))

    # small params in one SMEM vector with the Linear(1,1) affine folded in:
    #   [w_out*w_lin(20), w_out*b_lin + b_out]   (softmax sums to 1, so the fold is exact)
    w_out_f = jnp.asarray(w_out, jnp.float32).reshape(())
    scalars = jnp.concatenate([
        jnp.asarray(w_lin, jnp.float32).reshape(-1) * w_out_f,
        (w_out_f * jnp.asarray(b_lin, jnp.float32).reshape(())
         + jnp.asarray(b_out, jnp.float32).reshape(())).reshape(1),
    ])                                                                 # (TOPK+1,)
    w_att_row = jnp.asarray(w_att, jnp.float32).reshape(1, D)          # (1, D)

    out = pl.pallas_call(
        _make_kernel(L, l_pad, R),
        out_shape=jax.ShapeDtypeStruct((B_pad, 1, 1), jnp.float32),
        grid_spec=pltpu.PrefetchScalarGridSpec(
            num_scalar_prefetch=0,
            grid=(n_tiles,),
            in_specs=[
                pl.BlockSpec((bt, l_pad, D), lambda g: (g, 0, 0)),
                pl.BlockSpec((bt, R, D), lambda g: (g, 0, 0)),
                pl.BlockSpec((1, D), lambda g: (0, 0)),
                pl.BlockSpec(memory_space=pltpu.MemorySpace.SMEM),
            ],
            out_specs=pl.BlockSpec((bt, 1, 1), lambda g: (g, 0, 0)),
        ),
        compiler_params=pltpu.CompilerParams(
            dimension_semantics=("parallel",),
            vmem_limit_bytes=vmem_limit),
    )(q_reps, d_reps, w_att_row, scalars)
    return out[:B].reshape(B, 1)


def reference(q_reps, d_reps, w_att, w_lin, b_lin, w_out, b_out):
    # pure-JAX reference of the PyTorch forward
    qn = q_reps / jnp.maximum(
        jnp.linalg.norm(q_reps, axis=-1, keepdims=True), _EPS)
    dn = d_reps / jnp.maximum(
        jnp.linalg.norm(d_reps, axis=-1, keepdims=True), _EPS)
    matching = jnp.einsum('bld,brd->blr', qn, dn)
    topk_vals = jax.lax.top_k(matching, TOPK)[0]
    att = jax.nn.softmax(jnp.einsum('bld,d->bl', q_reps, w_att[:, 0]), axis=-1)
    dense = jnp.einsum('blk,k->bl', topk_vals, w_lin[:, 0]) + b_lin
    embed_flat = jnp.sum(dense * att, axis=-1, keepdims=True)
    return w_out * embed_flat + b_out


if __name__ == "__main__":
    key = jax.random.PRNGKey(0)
    B, L, R, V = 2, 8, 32, 64          # batch, query len, doc len, vocab
    D = BERT_SIZE

    k_emb, k_q, k_d, k_att, k_lin, k_o = jax.random.split(key, 6)

    # deterministic synthetic parameters (shapes from the module __init__)
    embed_table = jax.random.normal(k_emb, (V, D), jnp.float32)        # Embedding(V, 300)
    w_att = jax.random.normal(k_att, (D, 1), jnp.float32) * 0.05       # Attention: Linear(300,1,no bias)
    w_lin = jax.random.normal(k_lin, (TOPK, 1), jnp.float32) * 0.1     # Linear(20,1) weight (transposed)
    b_lin = jnp.float32(0.01)                                          # Linear(20,1) bias
    kw, kb = jax.random.split(k_o)
    w_out = jax.random.normal(kw, (), jnp.float32)                     # Linear(1,1) weight
    b_out = jax.random.normal(kb, (), jnp.float32)                     # Linear(1,1) bias

    # token inputs; encode() uses embed(tok + 1)
    query_tok = jax.random.randint(k_q, (B, L), 0, V - 1)
    doc_tok = jax.random.randint(k_d, (B, R), 0, V - 1)
    q_reps = embed_table[query_tok + 1]                                # (B, L, D)  -- glue gather
    d_reps = embed_table[doc_tok + 1]                                  # (B, R, D)

    out = drmmtks_forward(q_reps, d_reps, w_att, w_lin, b_lin, w_out, b_out)
    out = jax.block_until_ready(out)

    ref = reference(q_reps, d_reps, w_att, w_lin, b_lin, w_out, b_out)
    assert out.shape == (B, 1)
    assert jnp.allclose(out, ref, atol=2e-3, rtol=2e-3), (out, ref)
    print("KERNEL_OK")
</pallas_src>

<mosaic_0001>
module attributes {stable_mosaic.version = 11 : i64} {
  func.func @kernel(%arg0: i32, %arg1: memref<1x8x300xf32, #tpu.memory_space<vmem>>, %arg2: memref<1x32x300xf32, #tpu.memory_space<vmem>>, %arg3: memref<1x300xf32, #tpu.memory_space<vmem>>, %arg4: memref<21xf32, #tpu.memory_space<smem>>, %arg5: memref<1x1x1xf32, #tpu.memory_space<vmem>>) attributes {dimension_semantics = [#tpu.dimension_semantics<parallel>], iteration_bounds = array<i64: 2>, scalar_prefetch = 0 : i64, scratch_operands = 0 : i64, tpu.core_type = #tpu.core_type<tc>, window_params = [{transform_indices = @transform_0, window_bounds = array<i64: 1, 8, 300>}, {transform_indices = @transform_1, window_bounds = array<i64: 1, 32, 300>}, {pipeline_mode = #tpu.pipeline_mode<synchronous>, transform_indices = @transform_2, window_bounds = array<i64: 1, 300>}, {transform_indices = @transform_3, window_bounds = array<i64: 21>}, {transform_indices = @transform_4, window_bounds = array<i64: 1, 1, 1>}]} {
    %c0 = arith.constant 0 : index
    %c0_0 = arith.constant 0 : index
    %c0_1 = arith.constant 0 : index
    %0 = vector.load %arg1[%c0, %c0_0, %c0_1] : memref<1x8x300xf32, #tpu.memory_space<vmem>>, vector<1x8x300xf32>
    %c0_2 = arith.constant 0 : index
    %c0_3 = arith.constant 0 : index
    %c0_4 = arith.constant 0 : index
    %1 = vector.load %arg2[%c0_2, %c0_3, %c0_4] : memref<1x32x300xf32, #tpu.memory_space<vmem>>, vector<1x32x300xf32>
    %2 = arith.mulf %0, %0 : vector<1x8x300xf32>
    %cst = arith.constant dense<0.000000e+00> : vector<1x8xf32>
    %3 = vector.multi_reduction <add>, %2, %cst [2] : vector<1x8x300xf32> to vector<1x8xf32>
    %4 = vector.shape_cast %3 : vector<1x8xf32> to vector<1x8x1xf32>
    %5 = math.rsqrt %4 : vector<1x8x1xf32>
    %cst_5 = arith.constant 9.99999995E+11 : f32
    %6 = vector.broadcast %cst_5 : f32 to vector<1x8x1xf32>
    %7 = arith.minimumf %5, %6 : vector<1x8x1xf32>
    %8 = arith.mulf %1, %1 : vector<1x32x300xf32>
    %cst_6 = arith.constant dense<0.000000e+00> : vector<1x32xf32>
    %9 = vector.multi_reduction <add>, %8, %cst_6 [2] : vector<1x32x300xf32> to vector<1x32xf32>
    %10 = vector.shape_cast %9 : vector<1x32xf32> to vector<1x32x1xf32>
    %11 = math.rsqrt %10 : vector<1x32x1xf32>
    %cst_7 = arith.constant 9.99999995E+11 : f32
    %12 = vector.broadcast %cst_7 : f32 to vector<1x32x1xf32>
    %13 = arith.minimumf %11, %12 : vector<1x32x1xf32>
    %14 = vector.broadcast %7 : vector<1x8x1xf32> to vector<1x8x300xf32>
    %15 = arith.mulf %0, %14 : vector<1x8x300xf32>
    %16 = vector.broadcast %13 : vector<1x32x1xf32> to vector<1x32x300xf32>
    %17 = arith.mulf %1, %16 : vector<1x32x300xf32>
    %cst_8 = arith.constant dense<0.000000e+00> : vector<1x8x32xf32>
    %18 = tpu.matmul %15, %17, %cst_8 {dimension_numbers = #tpu.dot_dimension_numbers<[2], [2], [1], [1], [0, 0, 0, 1, 1, 1], [0], [0]>} : vector<1x8x300xf32>, vector<1x32x300xf32>, vector<1x8x32xf32> -> vector<1x8x32xf32>
    %19 = vector.shape_cast %18 : vector<1x8x32xf32> to vector<8x32xf32>
    %20 = tpu.transpose %19, [1, 0] : vector<8x32xf32> -> vector<32x8xf32>
    %21 = tpu.iota {dimensions = array<i32: 0>} : vector<32x1xi32>
    %22 = arith.sitofp %21 : vector<32x1xi32> to vector<32x1xf32>
    %cst_9 = arith.constant 0.000000e+00 : f32
    %23 = vector.broadcast %cst_9 : f32 to vector<1x8xf32>
    %cst_10 = arith.constant 3.200000e+01 : f32
    %c0_i32 = arith.constant 0 : i32
    %cst_11 = arith.constant dense<0xFF800000> : vector<8xf32>
    %24 = vector.multi_reduction <maximumf>, %20, %cst_11 [0] : vector<32x8xf32> to vector<8xf32>
    %25 = vector.shape_cast %24 : vector<8xf32> to vector<1x8xf32>
    %26 = arith.index_cast %c0_i32 : i32 to index
    %27 = memref.load %arg4[%26] : memref<21xf32, #tpu.memory_space<smem>>
    %28 = vector.broadcast %27 : f32 to vector<1x8xf32>
    %29 = arith.mulf %25, %28 : vector<1x8xf32>
    %30 = arith.addf %23, %29 : vector<1x8xf32>
    %31 = vector.broadcast %25 : vector<1x8xf32> to vector<32x8xf32>
    %32 = arith.cmpf oeq, %20, %31 : vector<32x8xf32>
    %33 = vector.shape_cast %22 : vector<32x1xf32> to vector<32x1xf32>
    %34 = vector.broadcast %33 : vector<32x1xf32> to vector<32x8xf32>
    %35 = vector.broadcast %cst_10 : f32 to vector<32x8xf32>
    %36 = arith.select %32, %34, %35 : vector<32x8xi1>, vector<32x8xf32>
    %cst_12 = arith.constant dense<0x7F800000> : vector<8xf32>
    %37 = vector.multi_reduction <minimumf>, %36, %cst_12 [0] : vector<32x8xf32> to vector<8xf32>
    %38 = vector.shape_cast %37 : vector<8xf32> to vector<1x8xf32>
    %39 = vector.broadcast %22 : vector<32x1xf32> to vector<32x8xf32>
    %40 = vector.broadcast %38 : vector<1x8xf32> to vector<32x8xf32>
    %41 = arith.cmpf oeq, %39, %40 : vector<32x8xf32>
    %cst_13 = arith.constant -3.000000e+38 : f32
    %42 = vector.broadcast %cst_13 : f32 to vector<32x8xf32>
    %43 = arith.select %41, %42, %20 : vector<32x8xi1>, vector<32x8xf32>
    %c1_i32 = arith.constant 1 : i32
    %cst_14 = arith.constant dense<0xFF800000> : vector<8xf32>
    %44 = vector.multi_reduction <maximumf>, %43, %cst_14 [0] : vector<32x8xf32> to vector<8xf32>
    %45 = vector.shape_cast %44 : vector<8xf32> to vector<1x8xf32>
    %46 = arith.index_cast %c1_i32 : i32 to index
    %47 = memref.load %arg4[%46] : memref<21xf32, #tpu.memory_space<smem>>
    %48 = vector.broadcast %47 : f32 to vector<1x8xf32>
    %49 = arith.mulf %45, %48 : vector<1x8xf32>
    %50 = arith.addf %30, %49 : vector<1x8xf32>
    %51 = vector.broadcast %45 : vector<1x8xf32> to vector<32x8xf32>
    %52 = arith.cmpf oeq, %43, %51 : vector<32x8xf32>
    %53 = vector.shape_cast %22 : vector<32x1xf32> to vector<32x1xf32>
    %54 = vector.broadcast %53 : vector<32x1xf32> to vector<32x8xf32>
    %55 = vector.broadcast %cst_10 : f32 to vector<32x8xf32>
    %56 = arith.select %52, %54, %55 : vector<32x8xi1>, vector<32x8xf32>
    %cst_15 = arith.constant dense<0x7F800000> : vector<8xf32>
    %57 = vector.multi_reduction <minimumf>, %56, %cst_15 [0] : vector<32x8xf32> to vector<8xf32>
    %58 = vector.shape_cast %57 : vector<8xf32> to vector<1x8xf32>
    %59 = vector.broadcast %22 : vector<32x1xf32> to vector<32x8xf32>
    %60 = vector.broadcast %58 : vector<1x8xf32> to vector<32x8xf32>
    %61 = arith.cmpf oeq, %59, %60 : vector<32x8xf32>
    %cst_16 = arith.constant -3.000000e+38 : f32
    %62 = vector.broadcast %cst_16 : f32 to vector<32x8xf32>
    %63 = arith.select %61, %62, %43 : vector<32x8xi1>, vector<32x8xf32>
    %c2_i32 = arith.constant 2 : i32
    %cst_17 = arith.constant dense<0xFF800000> : vector<8xf32>
    %64 = vector.multi_reduction <maximumf>, %63, %cst_17 [0] : vector<32x8xf32> to vector<8xf32>
    %65 = vector.shape_cast %64 : vector<8xf32> to vector<1x8xf32>
    %66 = arith.index_cast %c2_i32 : i32 to index
    %67 = memref.load %arg4[%66] : memref<21xf32, #tpu.memory_space<smem>>
    %68 = vector.broadcast %67 : f32 to vector<1x8xf32>
    %69 = arith.mulf %65, %68 : vector<1x8xf32>
    %70 = arith.addf %50, %69 : vector<1x8xf32>
    %71 = vector.broadcast %65 : vector<1x8xf32> to vector<32x8xf32>
    %72 = arith.cmpf oeq, %63, %71 : vector<32x8xf32>
    %73 = vector.shape_cast %22 : vector<32x1xf32> to vector<32x1xf32>
    %74 = vector.broadcast %73 : vector<32x1xf32> to vector<32x8xf32>
    %75 = vector.broadcast %cst_10 : f32 to vector<32x8xf32>
    %76 = arith.select %72, %74, %75 : vector<32x8xi1>, vector<32x8xf32>
    %cst_18 = arith.constant dense<0x7F800000> : vector<8xf32>
    %77 = vector.multi_reduction <minimumf>, %76, %cst_18 [0] : vector<32x8xf32> to vector<8xf32>
    %78 = vector.shape_cast %77 : vector<8xf32> to vector<1x8xf32>
    %79 = vector.broadcast %22 : vector<32x1xf32> to vector<32x8xf32>
    %80 = vector.broadcast %78 : vector<1x8xf32> to vector<32x8xf32>
    %81 = arith.cmpf oeq, %79, %80 : vector<32x8xf32>
    %cst_19 = arith.constant -3.000000e+38 : f32
    %82 = vector.broadcast %cst_19 : f32 to vector<32x8xf32>
    %83 = arith.select %81, %82, %63 : vector<32x8xi1>, vector<32x8xf32>
    %c3_i32 = arith.constant 3 : i32
    %cst_20 = arith.constant dense<0xFF800000> : vector<8xf32>
    %84 = vector.multi_reduction <maximumf>, %83, %cst_20 [0] : vector<32x8xf32> to vector<8xf32>
    %85 = vector.shape_cast %84 : vector<8xf32> to vector<1x8xf32>
    %86 = arith.index_cast %c3_i32 : i32 to index
    %87 = memref.load %arg4[%86] : memref<21xf32, #tpu.memory_space<smem>>
    %88 = vector.broadcast %87 : f32 to vector<1x8xf32>
    %89 = arith.mulf %85, %88 : vector<1x8xf32>
    %90 = arith.addf %70, %89 : vector<1x8xf32>
    %91 = vector.broadcast %85 : vector<1x8xf32> to vector<32x8xf32>
    %92 = arith.cmpf oeq, %83, %91 : vector<32x8xf32>
    %93 = vector.shape_cast %22 : vector<32x1xf32> to vector<32x1xf32>
    %94 = vector.broadcast %93 : vector<32x1xf32> to vector<32x8xf32>
    %95 = vector.broadcast %cst_10 : f32 to vector<32x8xf32>
    %96 = arith.select %92, %94, %95 : vector<32x8xi1>, vector<32x8xf32>
    %cst_21 = arith.constant dense<0x7F800000> : vector<8xf32>
    %97 = vector.multi_reduction <minimumf>, %96, %cst_21 [0] : vector<32x8xf32> to vector<8xf32>
    %98 = vector.shape_cast %97 : vector<8xf32> to vector<1x8xf32>
    %99 = vector.broadcast %22 : vector<32x1xf32> to vector<32x8xf32>
    %100 = vector.broadcast %98 : vector<1x8xf32> to vector<32x8xf32>
    %101 = arith.cmpf oeq, %99, %100 : vector<32x8xf32>
    %cst_22 = arith.constant -3.000000e+38 : f32
    %102 = vector.broadcast %cst_22 : f32 to vector<32x8xf32>
    %103 = arith.select %101, %102, %83 : vector<32x8xi1>, vector<32x8xf32>
    %c4_i32 = arith.constant 4 : i32
    %cst_23 = arith.constant dense<0xFF800000> : vector<8xf32>
    %104 = vector.multi_reduction <maximumf>, %103, %cst_23 [0] : vector<32x8xf32> to vector<8xf32>
    %105 = vector.shape_cast %104 : vector<8xf32> to vector<1x8xf32>
    %106 = arith.index_cast %c4_i32 : i32 to index
    %107 = memref.load %arg4[%106] : memref<21xf32, #tpu.memory_space<smem>>
    %108 = vector.broadcast %107 : f32 to vector<1x8xf32>
    %109 = arith.mulf %105, %108 : vector<1x8xf32>
    %110 = arith.addf %90, %109 : vector<1x8xf32>
    %111 = vector.broadcast %105 : vector<1x8xf32> to vector<32x8xf32>
    %112 = arith.cmpf oeq, %103, %111 : vector<32x8xf32>
    %113 = vector.shape_cast %22 : vector<32x1xf32> to vector<32x1xf32>
    %114 = vector.broadcast %113 : vector<32x1xf32> to vector<32x8xf32>
    %115 = vector.broadcast %cst_10 : f32 to vector<32x8xf32>
    %116 = arith.select %112, %114, %115 : vector<32x8xi1>, vector<32x8xf32>
    %cst_24 = arith.constant dense<0x7F800000> : vector<8xf32>
    %117 = vector.multi_reduction <minimumf>, %116, %cst_24 [0] : vector<32x8xf32> to vector<8xf32>
    %118 = vector.shape_cast %117 : vector<8xf32> to vector<1x8xf32>
    %119 = vector.broadcast %22 : vector<32x1xf32> to vector<32x8xf32>
    %120 = vector.broadcast %118 : vector<1x8xf32> to vector<32x8xf32>
    %121 = arith.cmpf oeq, %119, %120 : vector<32x8xf32>
    %cst_25 = arith.constant -3.000000e+38 : f32
    %122 = vector.broadcast %cst_25 : f32 to vector<32x8xf32>
    %123 = arith.select %121, %122, %103 : vector<32x8xi1>, vector<32x8xf32>
    %c5_i32 = arith.constant 5 : i32
    %cst_26 = arith.constant dense<0xFF800000> : vector<8xf32>
    %124 = vector.multi_reduction <maximumf>, %123, %cst_26 [0] : vector<32x8xf32> to vector<8xf32>
    %125 = vector.shape_cast %124 : vector<8xf32> to vector<1x8xf32>
    %126 = arith.index_cast %c5_i32 : i32 to index
    %127 = memref.load %arg4[%126] : memref<21xf32, #tpu.memory_space<smem>>
    %128 = vector.broadcast %127 : f32 to vector<1x8xf32>
    %129 = arith.mulf %125, %128 : vector<1x8xf32>
    %130 = arith.addf %110, %129 : vector<1x8xf32>
    %131 = vector.broadcast %125 : vector<1x8xf32> to vector<32x8xf32>
    %132 = arith.cmpf oeq, %123, %131 : vector<32x8xf32>
    %133 = vector.shape_cast %22 : vector<32x1xf32> to vector<32x1xf32>
    %134 = vector.broadcast %133 : vector<32x1xf32> to vector<32x8xf32>
    %135 = vector.broadcast %cst_10 : f32 to vector<32x8xf32>
    %136 = arith.select %132, %134, %135 : vector<32x8xi1>, vector<32x8xf32>
    %cst_27 = arith.constant dense<0x7F800000> : vector<8xf32>
    %137 = vector.multi_reduction <minimumf>, %136, %cst_27 [0] : vector<32x8xf32> to vector<8xf32>
    %138 = vector.shape_cast %137 : vector<8xf32> to vector<1x8xf32>
    %139 = vector.broadcast %22 : vector<32x1xf32> to vector<32x8xf32>
    %140 = vector.broadcast %138 : vector<1x8xf32> to vector<32x8xf32>
    %141 = arith.cmpf oeq, %139, %140 : vector<32x8xf32>
    %cst_28 = arith.constant -3.000000e+38 : f32
    %142 = vector.broadcast %cst_28 : f32 to vector<32x8xf32>
    %143 = arith.select %141, %142, %123 : vector<32x8xi1>, vector<32x8xf32>
    %c6_i32 = arith.constant 6 : i32
    %cst_29 = arith.constant dense<0xFF800000> : vector<8xf32>
    %144 = vector.multi_reduction <maximumf>, %143, %cst_29 [0] : vector<32x8xf32> to vector<8xf32>
    %145 = vector.shape_cast %144 : vector<8xf32> to vector<1x8xf32>
    %146 = arith.index_cast %c6_i32 : i32 to index
    %147 = memref.load %arg4[%146] : memref<21xf32, #tpu.memory_space<smem>>
    %148 = vector.broadcast %147 : f32 to vector<1x8xf32>
    %149 = arith.mulf %145, %148 : vector<1x8xf32>
    %150 = arith.addf %130, %149 : vector<1x8xf32>
    %151 = vector.broadcast %145 : vector<1x8xf32> to vector<32x8xf32>
    %152 = arith.cmpf oeq, %143, %151 : vector<32x8xf32>
    %153 = vector.shape_cast %22 : vector<32x1xf32> to vector<32x1xf32>
    %154 = vector.broadcast %153 : vector<32x1xf32> to vector<32x8xf32>
    %155 = vector.broadcast %cst_10 : f32 to vector<32x8xf32>
    %156 = arith.select %152, %154, %155 : vector<32x8xi1>, vector<32x8xf32>
    %cst_30 = arith.constant dense<0x7F800000> : vector<8xf32>
    %157 = vector.multi_reduction <minimumf>, %156, %cst_30 [0] : vector<32x8xf32> to vector<8xf32>
    %158 = vector.shape_cast %157 : vector<8xf32> to vector<1x8xf32>
    %159 = vector.broadcast %22 : vector<32x1xf32> to vector<32x8xf32>
    %160 = vector.broadcast %158 : vector<1x8xf32> to vector<32x8xf32>
    %161 = arith.cmpf oeq, %159, %160 : vector<32x8xf32>
    %cst_31 = arith.constant -3.000000e+38 : f32
    %162 = vector.broadcast %cst_31 : f32 to vector<32x8xf32>
    %163 = arith.select %161, %162, %143 : vector<32x8xi1>, vector<32x8xf32>
    %c7_i32 = arith.constant 7 : i32
    %cst_32 = arith.constant dense<0xFF800000> : vector<8xf32>
    %164 = vector.multi_reduction <maximumf>, %163, %cst_32 [0] : vector<32x8xf32> to vector<8xf32>
    %165 = vector.shape_cast %164 : vector<8xf32> to vector<1x8xf32>
    %166 = arith.index_cast %c7_i32 : i32 to index
    %167 = memref.load %arg4[%166] : memref<21xf32, #tpu.memory_space<smem>>
    %168 = vector.broadcast %167 : f32 to vector<1x8xf32>
    %169 = arith.mulf %165, %168 : vector<1x8xf32>
    %170 = arith.addf %150, %169 : vector<1x8xf32>
    %171 = vector.broadcast %165 : vector<1x8xf32> to vector<32x8xf32>
    %172 = arith.cmpf oeq, %163, %171 : vector<32x8xf32>
    %173 = vector.shape_cast %22 : vector<32x1xf32> to vector<32x1xf32>
    %174 = vector.broadcast %173 : vector<32x1xf32> to vector<32x8xf32>
    %175 = vector.broadcast %cst_10 : f32 to vector<32x8xf32>
    %176 = arith.select %172, %174, %175 : vector<32x8xi1>, vector<32x8xf32>
    %cst_33 = arith.constant dense<0x7F800000> : vector<8xf32>
    %177 = vector.multi_reduction <minimumf>, %176, %cst_33 [0] : vector<32x8xf32> to vector<8xf32>
    %178 = vector.shape_cast %177 : vector<8xf32> to vector<1x8xf32>
    %179 = vector.broadcast %22 : vector<32x1xf32> to vector<32x8xf32>
    %180 = vector.broadcast %178 : vector<1x8xf32> to vector<32x8xf32>
    %181 = arith.cmpf oeq, %179, %180 : vector<32x8xf32>
    %cst_34 = arith.constant -3.000000e+38 : f32
    %182 = vector.broadcast %cst_34 : f32 to vector<32x8xf32>
    %183 = arith.select %181, %182, %163 : vector<32x8xi1>, vector<32x8xf32>
    %c8_i32 = arith.constant 8 : i32
    %cst_35 = arith.constant dense<0xFF800000> : vector<8xf32>
    %184 = vector.multi_reduction <maximumf>, %183, %cst_35 [0] : vector<32x8xf32> to vector<8xf32>
    %185 = vector.shape_cast %184 : vector<8xf32> to vector<1x8xf32>
    %186 = arith.index_cast %c8_i32 : i32 to index
    %187 = memref.load %arg4[%186] : memref<21xf32, #tpu.memory_space<smem>>
    %188 = vector.broadcast %187 : f32 to vector<1x8xf32>
    %189 = arith.mulf %185, %188 : vector<1x8xf32>
    %190 = arith.addf %170, %189 : vector<1x8xf32>
    %191 = vector.broadcast %185 : vector<1x8xf32> to vector<32x8xf32>
    %192 = arith.cmpf oeq, %183, %191 : vector<32x8xf32>
    %193 = vector.shape_cast %22 : vector<32x1xf32> to vector<32x1xf32>
    %194 = vector.broadcast %193 : vector<32x1xf32> to vector<32x8xf32>
    %195 = vector.broadcast %cst_10 : f32 to vector<32x8xf32>
    %196 = arith.select %192, %194, %195 : vector<32x8xi1>, vector<32x8xf32>
    %cst_36 = arith.constant dense<0x7F800000> : vector<8xf32>
    %197 = vector.multi_reduction <minimumf>, %196, %cst_36 [0] : vector<32x8xf32> to vector<8xf32>
    %198 = vector.shape_cast %197 : vector<8xf32> to vector<1x8xf32>
    %199 = vector.broadcast %22 : vector<32x1xf32> to vector<32x8xf32>
    %200 = vector.broadcast %198 : vector<1x8xf32> to vector<32x8xf32>
    %201 = arith.cmpf oeq, %199, %200 : vector<32x8xf32>
    %cst_37 = arith.constant -3.000000e+38 : f32
    %202 = vector.broadcast %cst_37 : f32 to vector<32x8xf32>
    %203 = arith.select %201, %202, %183 : vector<32x8xi1>, vector<32x8xf32>
    %c9_i32 = arith.constant 9 : i32
    %cst_38 = arith.constant dense<0xFF800000> : vector<8xf32>
    %204 = vector.multi_reduction <maximumf>, %203, %cst_38 [0] : vector<32x8xf32> to vector<8xf32>
    %205 = vector.shape_cast %204 : vector<8xf32> to vector<1x8xf32>
    %206 = arith.index_cast %c9_i32 : i32 to index
    %207 = memref.load %arg4[%206] : memref<21xf32, #tpu.memory_space<smem>>
    %208 = vector.broadcast %207 : f32 to vector<1x8xf32>
    %209 = arith.mulf %205, %208 : vector<1x8xf32>
    %210 = arith.addf %190, %209 : vector<1x8xf32>
    %211 = vector.broadcast %205 : vector<1x8xf32> to vector<32x8xf32>
    %212 = arith.cmpf oeq, %203, %211 : vector<32x8xf32>
    %213 = vector.shape_cast %22 : vector<32x1xf32> to vector<32x1xf32>
    %214 = vector.broadcast %213 : vector<32x1xf32> to vector<32x8xf32>
    %215 = vector.broadcast %cst_10 : f32 to vector<32x8xf32>
    %216 = arith.select %212, %214, %215 : vector<32x8xi1>, vector<32x8xf32>
    %cst_39 = arith.constant dense<0x7F800000> : vector<8xf32>
    %217 = vector.multi_reduction <minimumf>, %216, %cst_39 [0] : vector<32x8xf32> to vector<8xf32>
    %218 = vector.shape_cast %217 : vector<8xf32> to vector<1x8xf32>
    %219 = vector.broadcast %22 : vector<32x1xf32> to vector<32x8xf32>
    %220 = vector.broadcast %218 : vector<1x8xf32> to vector<32x8xf32>
    %221 = arith.cmpf oeq, %219, %220 : vector<32x8xf32>
    %cst_40 = arith.constant -3.000000e+38 : f32
    %222 = vector.broadcast %cst_40 : f32 to vector<32x8xf32>
    %223 = arith.select %221, %222, %203 : vector<32x8xi1>, vector<32x8xf32>
    %c10_i32 = arith.constant 10 : i32
    %cst_41 = arith.constant dense<0xFF800000> : vector<8xf32>
    %224 = vector.multi_reduction <maximumf>, %223, %cst_41 [0] : vector<32x8xf32> to vector<8xf32>
    %225 = vector.shape_cast %224 : vector<8xf32> to vector<1x8xf32>
    %226 = arith.index_cast %c10_i32 : i32 to index
    %227 = memref.load %arg4[%226] : memref<21xf32, #tpu.memory_space<smem>>
    %228 = vector.broadcast %227 : f32 to vector<1x8xf32>
    %229 = arith.mulf %225, %228 : vector<1x8xf32>
    %230 = arith.addf %210, %229 : vector<1x8xf32>
    %231 = vector.broadcast %225 : vector<1x8xf32> to vector<32x8xf32>
    %232 = arith.cmpf oeq, %223, %231 : vector<32x8xf32>
    %233 = vector.shape_cast %22 : vector<32x1xf32> to vector<32x1xf32>
    %234 = vector.broadcast %233 : vector<32x1xf32> to vector<32x8xf32>
    %235 = vector.broadcast %cst_10 : f32 to vector<32x8xf32>
    %236 = arith.select %232, %234, %235 : vector<32x8xi1>, vector<32x8xf32>
    %cst_42 = arith.constant dense<0x7F800000> : vector<8xf32>
    %237 = vector.multi_reduction <minimumf>, %236, %cst_42 [0] : vector<32x8xf32> to vector<8xf32>
    %238 = vector.shape_cast %237 : vector<8xf32> to vector<1x8xf32>
    %239 = vector.broadcast %22 : vector<32x1xf32> to vector<32x8xf32>
    %240 = vector.broadcast %238 : vector<1x8xf32> to vector<32x8xf32>
    %241 = arith.cmpf oeq, %239, %240 : vector<32x8xf32>
    %cst_43 = arith.constant -3.000000e+38 : f32
    %242 = vector.broadcast %cst_43 : f32 to vector<32x8xf32>
    %243 = arith.select %241, %242, %223 : vector<32x8xi1>, vector<32x8xf32>
    %c11_i32 = arith.constant 11 : i32
    %cst_44 = arith.constant dense<0xFF800000> : vector<8xf32>
    %244 = vector.multi_reduction <maximumf>, %243, %cst_44 [0] : vector<32x8xf32> to vector<8xf32>
    %245 = vector.shape_cast %244 : vector<8xf32> to vector<1x8xf32>
    %246 = arith.index_cast %c11_i32 : i32 to index
    %247 = memref.load %arg4[%246] : memref<21xf32, #tpu.memory_space<smem>>
    %248 = vector.broadcast %247 : f32 to vector<1x8xf32>
    %249 = arith.mulf %245, %248 : vector<1x8xf32>
    %250 = arith.addf %230, %249 : vector<1x8xf32>
    %251 = vector.broadcast %245 : vector<1x8xf32> to vector<32x8xf32>
    %252 = arith.cmpf oeq, %243, %251 : vector<32x8xf32>
    %253 = vector.shape_cast %22 : vector<32x1xf32> to vector<32x1xf32>
    %254 = vector.broadcast %253 : vector<32x1xf32> to vector<32x8xf32>
    %255 = vector.broadcast %cst_10 : f32 to vector<32x8xf32>
    %256 = arith.select %252, %254, %255 : vector<32x8xi1>, vector<32x8xf32>
    %cst_45 = arith.constant dense<0x7F800000> : vector<8xf32>
    %257 = vector.multi_reduction <minimumf>, %256, %cst_45 [0] : vector<32x8xf32> to vector<8xf32>
    %258 = vector.shape_cast %257 : vector<8xf32> to vector<1x8xf32>
    %259 = vector.broadcast %22 : vector<32x1xf32> to vector<32x8xf32>
    %260 = vector.broadcast %258 : vector<1x8xf32> to vector<32x8xf32>
    %261 = arith.cmpf oeq, %259, %260 : vector<32x8xf32>
    %cst_46 = arith.constant -3.000000e+38 : f32
    %262 = vector.broadcast %cst_46 : f32 to vector<32x8xf32>
    %263 = arith.select %261, %262, %243 : vector<32x8xi1>, vector<32x8xf32>
    %c12_i32 = arith.constant 12 : i32
    %cst_47 = arith.constant dense<0xFF800000> : vector<8xf32>
    %264 = vector.multi_reduction <maximumf>, %263, %cst_47 [0] : vector<32x8xf32> to vector<8xf32>
    %265 = vector.shape_cast %264 : vector<8xf32> to vector<1x8xf32>
    %266 = arith.index_cast %c12_i32 : i32 to index
    %267 = memref.load %arg4[%266] : memref<21xf32, #tpu.memory_space<smem>>
    %268 = vector.broadcast %267 : f32 to vector<1x8xf32>
    %269 = arith.mulf %265, %268 : vector<1x8xf32>
    %270 = arith.addf %250, %269 : vector<1x8xf32>
    %271 = vector.broadcast %265 : vector<1x8xf32> to vector<32x8xf32>
    %272 = arith.cmpf oeq, %263, %271 : vector<32x8xf32>
    %273 = vector.shape_cast %22 : vector<32x1xf32> to vector<32x1xf32>
    %274 = vector.broadcast %273 : vector<32x1xf32> to vector<32x8xf32>
    %275 = vector.broadcast %cst_10 : f32 to vector<32x8xf32>
    %276 = arith.select %272, %274, %275 : vector<32x8xi1>, vector<32x8xf32>
    %cst_48 = arith.constant dense<0x7F800000> : vector<8xf32>
    %277 = vector.multi_reduction <minimumf>, %276, %cst_48 [0] : vector<32x8xf32> to vector<8xf32>
    %278 = vector.shape_cast %277 : vector<8xf32> to vector<1x8xf32>
    %279 = vector.broadcast %22 : vector<32x1xf32> to vector<32x8xf32>
    %280 = vector.broadcast %278 : vector<1x8xf32> to vector<32x8xf32>
    %281 = arith.cmpf oeq, %279, %280 : vector<32x8xf32>
    %cst_49 = arith.constant -3.000000e+38 : f32
    %282 = vector.broadcast %cst_49 : f32 to vector<32x8xf32>
    %283 = arith.select %281, %282, %263 : vector<32x8xi1>, vector<32x8xf32>
    %c13_i32 = arith.constant 13 : i32
    %cst_50 = arith.constant dense<0xFF800000> : vector<8xf32>
    %284 = vector.multi_reduction <maximumf>, %283, %cst_50 [0] : vector<32x8xf32> to vector<8xf32>
    %285 = vector.shape_cast %284 : vector<8xf32> to vector<1x8xf32>
    %286 = arith.index_cast %c13_i32 : i32 to index
    %287 = memref.load %arg4[%286] : memref<21xf32, #tpu.memory_space<smem>>
    %288 = vector.broadcast %287 : f32 to vector<1x8xf32>
    %289 = arith.mulf %285, %288 : vector<1x8xf32>
    %290 = arith.addf %270, %289 : vector<1x8xf32>
    %291 = vector.broadcast %285 : vector<1x8xf32> to vector<32x8xf32>
    %292 = arith.cmpf oeq, %283, %291 : vector<32x8xf32>
    %293 = vector.shape_cast %22 : vector<32x1xf32> to vector<32x1xf32>
    %294 = vector.broadcast %293 : vector<32x1xf32> to vector<32x8xf32>
    %295 = vector.broadcast %cst_10 : f32 to vector<32x8xf32>
    %296 = arith.select %292, %294, %295 : vector<32x8xi1>, vector<32x8xf32>
    %cst_51 = arith.constant dense<0x7F800000> : vector<8xf32>
    %297 = vector.multi_reduction <minimumf>, %296, %cst_51 [0] : vector<32x8xf32> to vector<8xf32>
    %298 = vector.shape_cast %297 : vector<8xf32> to vector<1x8xf32>
    %299 = vector.broadcast %22 : vector<32x1xf32> to vector<32x8xf32>
    %300 = vector.broadcast %298 : vector<1x8xf32> to vector<32x8xf32>
    %301 = arith.cmpf oeq, %299, %300 : vector<32x8xf32>
    %cst_52 = arith.constant -3.000000e+38 : f32
    %302 = vector.broadcast %cst_52 : f32 to vector<32x8xf32>
    %303 = arith.select %301, %302, %283 : vector<32x8xi1>, vector<32x8xf32>
    %c14_i32 = arith.constant 14 : i32
    %cst_53 = arith.constant dense<0xFF800000> : vector<8xf32>
    %304 = vector.multi_reduction <maximumf>, %303, %cst_53 [0] : vector<32x8xf32> to vector<8xf32>
    %305 = vector.shape_cast %304 : vector<8xf32> to vector<1x8xf32>
    %306 = arith.index_cast %c14_i32 : i32 to index
    %307 = memref.load %arg4[%306] : memref<21xf32, #tpu.memory_space<smem>>
    %308 = vector.broadcast %307 : f32 to vector<1x8xf32>
    %309 = arith.mulf %305, %308 : vector<1x8xf32>
    %310 = arith.addf %290, %309 : vector<1x8xf32>
    %311 = vector.broadcast %305 : vector<1x8xf32> to vector<32x8xf32>
    %312 = arith.cmpf oeq, %303, %311 : vector<32x8xf32>
    %313 = vector.shape_cast %22 : vector<32x1xf32> to vector<32x1xf32>
    %314 = vector.broadcast %313 : vector<32x1xf32> to vector<32x8xf32>
    %315 = vector.broadcast %cst_10 : f32 to vector<32x8xf32>
    %316 = arith.select %312, %314, %315 : vector<32x8xi1>, vector<32x8xf32>
    %cst_54 = arith.constant dense<0x7F800000> : vector<8xf32>
    %317 = vector.multi_reduction <minimumf>, %316, %cst_54 [0] : vector<32x8xf32> to vector<8xf32>
    %318 = vector.shape_cast %317 : vector<8xf32> to vector<1x8xf32>
    %319 = vector.broadcast %22 : vector<32x1xf32> to vector<32x8xf32>
    %320 = vector.broadcast %318 : vector<1x8xf32> to vector<32x8xf32>
    %321 = arith.cmpf oeq, %319, %320 : vector<32x8xf32>
    %cst_55 = arith.constant -3.000000e+38 : f32
    %322 = vector.broadcast %cst_55 : f32 to vector<32x8xf32>
    %323 = arith.select %321, %322, %303 : vector<32x8xi1>, vector<32x8xf32>
    %c15_i32 = arith.constant 15 : i32
    %cst_56 = arith.constant dense<0xFF800000> : vector<8xf32>
    %324 = vector.multi_reduction <maximumf>, %323, %cst_56 [0] : vector<32x8xf32> to vector<8xf32>
    %325 = vector.shape_cast %324 : vector<8xf32> to vector<1x8xf32>
    %326 = arith.index_cast %c15_i32 : i32 to index
    %327 = memref.load %arg4[%326] : memref<21xf32, #tpu.memory_space<smem>>
    %328 = vector.broadcast %327 : f32 to vector<1x8xf32>
    %329 = arith.mulf %325, %328 : vector<1x8xf32>
    %330 = arith.addf %310, %329 : vector<1x8xf32>
    %331 = vector.broadcast %325 : vector<1x8xf32> to vector<32x8xf32>
    %332 = arith.cmpf oeq, %323, %331 : vector<32x8xf32>
    %333 = vector.shape_cast %22 : vector<32x1xf32> to vector<32x1xf32>
    %334 = vector.broadcast %333 : vector<32x1xf32> to vector<32x8xf32>
    %335 = vector.broadcast %cst_10 : f32 to vector<32x8xf32>
    %336 = arith.select %332, %334, %335 : vector<32x8xi1>, vector<32x8xf32>
    %cst_57 = arith.constant dense<0x7F800000> : vector<8xf32>
    %337 = vector.multi_reduction <minimumf>, %336, %cst_57 [0] : vector<32x8xf32> to vector<8xf32>
    %338 = vector.shape_cast %337 : vector<8xf32> to vector<1x8xf32>
    %339 = vector.broadcast %22 : vector<32x1xf32> to vector<32x8xf32>
    %340 = vector.broadcast %338 : vector<1x8xf32> to vector<32x8xf32>
    %341 = arith.cmpf oeq, %339, %340 : vector<32x8xf32>
    %cst_58 = arith.constant -3.000000e+38 : f32
    %342 = vector.broadcast %cst_58 : f32 to vector<32x8xf32>
    %343 = arith.select %341, %342, %323 : vector<32x8xi1>, vector<32x8xf32>
    %c16_i32 = arith.constant 16 : i32
    %cst_59 = arith.constant dense<0xFF800000> : vector<8xf32>
    %344 = vector.multi_reduction <maximumf>, %343, %cst_59 [0] : vector<32x8xf32> to vector<8xf32>
    %345 = vector.shape_cast %344 : vector<8xf32> to vector<1x8xf32>
    %346 = arith.index_cast %c16_i32 : i32 to index
    %347 = memref.load %arg4[%346] : memref<21xf32, #tpu.memory_space<smem>>
    %348 = vector.broadcast %347 : f32 to vector<1x8xf32>
    %349 = arith.mulf %345, %348 : vector<1x8xf32>
    %350 = arith.addf %330, %349 : vector<1x8xf32>
    %351 = vector.broadcast %345 : vector<1x8xf32> to vector<32x8xf32>
    %352 = arith.cmpf oeq, %343, %351 : vector<32x8xf32>
    %353 = vector.shape_cast %22 : vector<32x1xf32> to vector<32x1xf32>
    %354 = vector.broadcast %353 : vector<32x1xf32> to vector<32x8xf32>
    %355 = vector.broadcast %cst_10 : f32 to vector<32x8xf32>
    %356 = arith.select %352, %354, %355 : vector<32x8xi1>, vector<32x8xf32>
    %cst_60 = arith.constant dense<0x7F800000> : vector<8xf32>
    %357 = vector.multi_reduction <minimumf>, %356, %cst_60 [0] : vector<32x8xf32> to vector<8xf32>
    %358 = vector.shape_cast %357 : vector<8xf32> to vector<1x8xf32>
    %359 = vector.broadcast %22 : vector<32x1xf32> to vector<32x8xf32>
    %360 = vector.broadcast %358 : vector<1x8xf32> to vector<32x8xf32>
    %361 = arith.cmpf oeq, %359, %360 : vector<32x8xf32>
    %cst_61 = arith.constant -3.000000e+38 : f32
    %362 = vector.broadcast %cst_61 : f32 to vector<32x8xf32>
    %363 = arith.select %361, %362, %343 : vector<32x8xi1>, vector<32x8xf32>
    %c17_i32 = arith.constant 17 : i32
    %cst_62 = arith.constant dense<0xFF800000> : vector<8xf32>
    %364 = vector.multi_reduction <maximumf>, %363, %cst_62 [0] : vector<32x8xf32> to vector<8xf32>
    %365 = vector.shape_cast %364 : vector<8xf32> to vector<1x8xf32>
    %366 = arith.index_cast %c17_i32 : i32 to index
    %367 = memref.load %arg4[%366] : memref<21xf32, #tpu.memory_space<smem>>
    %368 = vector.broadcast %367 : f32 to vector<1x8xf32>
    %369 = arith.mulf %365, %368 : vector<1x8xf32>
    %370 = arith.addf %350, %369 : vector<1x8xf32>
    %371 = vector.broadcast %365 : vector<1x8xf32> to vector<32x8xf32>
    %372 = arith.cmpf oeq, %363, %371 : vector<32x8xf32>
    %373 = vector.shape_cast %22 : vector<32x1xf32> to vector<32x1xf32>
    %374 = vector.broadcast %373 : vector<32x1xf32> to vector<32x8xf32>
    %375 = vector.broadcast %cst_10 : f32 to vector<32x8xf32>
    %376 = arith.select %372, %374, %375 : vector<32x8xi1>, vector<32x8xf32>
    %cst_63 = arith.constant dense<0x7F800000> : vector<8xf32>
    %377 = vector.multi_reduction <minimumf>, %376, %cst_63 [0] : vector<32x8xf32> to vector<8xf32>
    %378 = vector.shape_cast %377 : vector<8xf32> to vector<1x8xf32>
    %379 = vector.broadcast %22 : vector<32x1xf32> to vector<32x8xf32>
    %380 = vector.broadcast %378 : vector<1x8xf32> to vector<32x8xf32>
    %381 = arith.cmpf oeq, %379, %380 : vector<32x8xf32>
    %cst_64 = arith.constant -3.000000e+38 : f32
    %382 = vector.broadcast %cst_64 : f32 to vector<32x8xf32>
    %383 = arith.select %381, %382, %363 : vector<32x8xi1>, vector<32x8xf32>
    %c18_i32 = arith.constant 18 : i32
    %cst_65 = arith.constant dense<0xFF800000> : vector<8xf32>
    %384 = vector.multi_reduction <maximumf>, %383, %cst_65 [0] : vector<32x8xf32> to vector<8xf32>
    %385 = vector.shape_cast %384 : vector<8xf32> to vector<1x8xf32>
    %386 = arith.index_cast %c18_i32 : i32 to index
    %387 = memref.load %arg4[%386] : memref<21xf32, #tpu.memory_space<smem>>
    %388 = vector.broadcast %387 : f32 to vector<1x8xf32>
    %389 = arith.mulf %385, %388 : vector<1x8xf32>
    %390 = arith.addf %370, %389 : vector<1x8xf32>
    %391 = vector.broadcast %385 : vector<1x8xf32> to vector<32x8xf32>
    %392 = arith.cmpf oeq, %383, %391 : vector<32x8xf32>
    %393 = vector.shape_cast %22 : vector<32x1xf32> to vector<32x1xf32>
    %394 = vector.broadcast %393 : vector<32x1xf32> to vector<32x8xf32>
    %395 = vector.broadcast %cst_10 : f32 to vector<32x8xf32>
    %396 = arith.select %392, %394, %395 : vector<32x8xi1>, vector<32x8xf32>
    %cst_66 = arith.constant dense<0x7F800000> : vector<8xf32>
    %397 = vector.multi_reduction <minimumf>, %396, %cst_66 [0] : vector<32x8xf32> to vector<8xf32>
    %398 = vector.shape_cast %397 : vector<8xf32> to vector<1x8xf32>
    %399 = vector.broadcast %22 : vector<32x1xf32> to vector<32x8xf32>
    %400 = vector.broadcast %398 : vector<1x8xf32> to vector<32x8xf32>
    %401 = arith.cmpf oeq, %399, %400 : vector<32x8xf32>
    %cst_67 = arith.constant -3.000000e+38 : f32
    %402 = vector.broadcast %cst_67 : f32 to vector<32x8xf32>
    %403 = arith.select %401, %402, %383 : vector<32x8xi1>, vector<32x8xf32>
    %c19_i32 = arith.constant 19 : i32
    %cst_68 = arith.constant dense<0xFF800000> : vector<8xf32>
    %404 = vector.multi_reduction <maximumf>, %403, %cst_68 [0] : vector<32x8xf32> to vector<8xf32>
    %405 = vector.shape_cast %404 : vector<8xf32> to vector<1x8xf32>
    %406 = arith.index_cast %c19_i32 : i32 to index
    %407 = memref.load %arg4[%406] : memref<21xf32, #tpu.memory_space<smem>>
    %408 = vector.broadcast %407 : f32 to vector<1x8xf32>
    %409 = arith.mulf %405, %408 : vector<1x8xf32>
    %410 = arith.addf %390, %409 : vector<1x8xf32>
    %411 = vector.broadcast %405 : vector<1x8xf32> to vector<32x8xf32>
    %412 = arith.cmpf oeq, %403, %411 : vector<32x8xf32>
    %413 = vector.shape_cast %22 : vector<32x1xf32> to vector<32x1xf32>
    %414 = vector.broadcast %413 : vector<32x1xf32> to vector<32x8xf32>
    %415 = vector.broadcast %cst_10 : f32 to vector<32x8xf32>
    %416 = arith.select %412, %414, %415 : vector<32x8xi1>, vector<32x8xf32>
    %cst_69 = arith.constant dense<0x7F800000> : vector<8xf32>
    %417 = vector.multi_reduction <minimumf>, %416, %cst_69 [0] : vector<32x8xf32> to vector<8xf32>
    %418 = vector.shape_cast %417 : vector<8xf32> to vector<1x8xf32>
    %419 = vector.broadcast %22 : vector<32x1xf32> to vector<32x8xf32>
    %420 = vector.broadcast %418 : vector<1x8xf32> to vector<32x8xf32>
    %421 = arith.cmpf oeq, %419, %420 : vector<32x8xf32>
    %cst_70 = arith.constant -3.000000e+38 : f32
    %422 = vector.broadcast %cst_70 : f32 to vector<32x8xf32>
    %423 = arith.select %421, %422, %403 : vector<32x8xi1>, vector<32x8xf32>
    %c20_i32 = arith.constant 20 : i32
    %424 = vector.shape_cast %410 : vector<1x8xf32> to vector<1x8xf32>
    %425 = vector.broadcast %424 : vector<1x8xf32> to vector<8x8xf32>
    %426 = tpu.transpose %425, [1, 0] : vector<8x8xf32> -> vector<8x8xf32>
    %427 = vector.extract_strided_slice %426 {offsets = [0, 0], sizes = [8, 1], strides = [1, 1]} : vector<8x8xf32> to vector<8x1xf32>
    %428 = vector.shape_cast %427 : vector<8x1xf32> to vector<1x8x1xf32>
    %c0_71 = arith.constant 0 : index
    %c0_72 = arith.constant 0 : index
    %429 = vector.load %arg3[%c0_71, %c0_72] : memref<1x300xf32, #tpu.memory_space<vmem>>, vector<1x300xf32>
    %430 = vector.shape_cast %429 : vector<1x300xf32> to vector<1x1x300xf32>
    %431 = vector.broadcast %430 : vector<1x1x300xf32> to vector<1x8x300xf32>
    %432 = arith.mulf %0, %431 : vector<1x8x300xf32>
    %cst_73 = arith.constant dense<0.000000e+00> : vector<1x8xf32>
    %433 = vector.multi_reduction <add>, %432, %cst_73 [2] : vector<1x8x300xf32> to vector<1x8xf32>
    %434 = vector.shape_cast %433 : vector<1x8xf32> to vector<1x8x1xf32>
    %cst_74 = arith.constant dense<0xFF800000> : vector<1x1xf32>
    %435 = vector.multi_reduction <maximumf>, %434, %cst_74 [1] : vector<1x8x1xf32> to vector<1x1xf32>
    %436 = vector.shape_cast %435 : vector<1x1xf32> to vector<1x1x1xf32>
    %437 = vector.broadcast %436 : vector<1x1x1xf32> to vector<1x8x1xf32>
    %438 = arith.subf %434, %437 : vector<1x8x1xf32>
    %439 = math.exp %438 : vector<1x8x1xf32>
    %cst_75 = arith.constant dense<0.000000e+00> : vector<1x1xf32>
    %440 = vector.multi_reduction <add>, %439, %cst_75 [1] : vector<1x8x1xf32> to vector<1x1xf32>
    %441 = vector.shape_cast %440 : vector<1x1xf32> to vector<1x1x1xf32>
    %442 = tpu.reciprocal %441 {approx = true} : vector<1x1x1xf32> -> vector<1x1x1xf32>
    %443 = vector.broadcast %442 : vector<1x1x1xf32> to vector<1x8x1xf32>
    %444 = arith.mulf %439, %443 : vector<1x8x1xf32>
    %445 = arith.mulf %428, %444 : vector<1x8x1xf32>
    %cst_76 = arith.constant dense<0.000000e+00> : vector<1x1xf32>
    %446 = vector.multi_reduction <add>, %445, %cst_76 [1] : vector<1x8x1xf32> to vector<1x1xf32>
    %447 = vector.shape_cast %446 : vector<1x1xf32> to vector<1x1x1xf32>
    %c20 = arith.constant 20 : index
    %448 = memref.load %arg4[%c20] : memref<21xf32, #tpu.memory_space<smem>>
    %449 = vector.broadcast %448 : f32 to vector<1x1x1xf32>
    %450 = arith.addf %447, %449 : vector<1x1x1xf32>
    %c0_77 = arith.constant 0 : index
    %c0_78 = arith.constant 0 : index
    %c0_79 = arith.constant 0 : index
    %451 = vector.load %arg5[%c0_77, %c0_78, %c0_79] : memref<1x1x1xf32, #tpu.memory_space<vmem>>, vector<1x1x1xf32>
    tpu.vector_store %arg5[%c0_77, %c0_78, %c0_79], %450 {strides = array<i32>} : memref<1x1x1xf32, #tpu.memory_space<vmem>>, vector<1x1x1xf32>,
    return
  }
  func.func @transform_0(%arg0: i32) -> (i32, i32, i32) {
    %c0_i32 = arith.constant 0 : i32
    %c0_i32_0 = arith.constant 0 : i32
    %c0_i32_1 = arith.constant 0 : i32
    return %arg0, %c0_i32, %c0_i32_0 : i32, i32, i32
  }
  func.func @transform_1(%arg0: i32) -> (i32, i32, i32) {
    %c0_i32 = arith.constant 0 : i32
    %c0_i32_0 = arith.constant 0 : i32
    %c0_i32_1 = arith.constant 0 : i32
    return %arg0, %c0_i32, %c0_i32_0 : i32, i32, i32
  }
  func.func @transform_2(%arg0: i32) -> (i32, i32) {
    %c0_i32 = arith.constant 0 : i32
    %c0_i32_0 = arith.constant 0 : i32
    %c0_i32_1 = arith.constant 0 : i32
    return %c0_i32, %c0_i32_0 : i32, i32
  }
  func.func @transform_3(%arg0: i32) -> i32 {
    %c0_i32 = arith.constant 0 : i32
    %c0_i32_0 = arith.constant 0 : i32
    return %c0_i32 : i32
  }
  func.func @transform_4(%arg0: i32) -> (i32, i32, i32) {
    %c0_i32 = arith.constant 0 : i32
    %c0_i32_0 = arith.constant 0 : i32
    %c0_i32_1 = arith.constant 0 : i32
    return %arg0, %c0_i32, %c0_i32_0 : i32, i32, i32
  }
}

</mosaic_0001>

<bundles_post_ra>
// kernel: tpu_custom_call.1
= control target key start
LH: loop header
LB: loop body
LE: loop exit
PB: predicated region body
PF: predicated region fallthrough
CT: control target
= control target key end

     0   :  { %9 = vsyncpa [#allocation3], 0  ;;  %s2538_s0 = inlined_call_operand.hbm [shape: f32[2,8,300], index: 0, kind: input, shape index: {}]   ;;  %s2539_s1 = inlined_call_operand.hbm [shape: f32[2,32,300], index: 1, kind: input, shape index: {}]   ;;  %s2540_s2 = inlined_call_operand.vmem [shape: f32[1,300], index: 2, kind: input, shape index: {}]   ;;  %s2541_s3 = inlined_call_operand.vmem [shape: f32[21], index: 3, kind: input, shape index: {}]   ;;  %s2542_s4 = inlined_call_operand.vmem [shape: f32[2,1,1], index: 4, kind: output, shape index: {}]  }
   0x1   :  { %11 = vsyncpa [#allocation3 + $0x1], 0 }
   0x2   :  { %12 = vsyncpa [#allocation6], 0 }
   0x3   :  { %14 = vsyncpa [#allocation6 + $0x1], 0 }
   0x4   :  { %15 = vsyncpa [#allocation4], 0  ;;  %s1920_s15 = smov 0   ;;  %s1922_s16 = smov 0  }
   0x5   :  { %s1924_s17 = smov 0   ;;  %s1926_s18 = smov 0  }
   0x6 LB: > { %s1939_s19 = sadd.s32 4294967295, %s1885_s18   ;;  %p41_p0 = scmp.ne.s32.totalorder %s1877_s16, %s1873_s15  ;;  %s1885_s18 = sphi %s1926_s18, %s2558_s18   ;;  %s1881_s17 = sphi %s1924_s17, %s2557_s17   ;;  %s1877_s16 = sphi %s1922_s16, %s2556_s16   ;;  %s1873_s15 = sphi %s1920_s15, %s2555_s15  }
   0x7   : > { %p2543_p1 = scmp.eq.s32.totalorder %s1939_s19, 0  ;;  %p1618_p2 = scmp.ge.s32.totalorder %s1885_s18, 1 }
   0x8   : > { %p146_p3 = scmp.lt.s32.totalorder %s1885_s18, 3  ;;  %s162_s23 = sshll.u32 %s2541_s3, 4  ;;  %s163_s23 = int_to_ptr.vmem [resolvable:$true] %s162_s23 }
   0x9   : > { %p1947_p4 = por %p2543_p1, %p41_p0  ;;  %s1961_s25 = sadd.s32 1, %s1885_s18  }
   0xa   : > { %p1954_p5 = pnand %p1618_p2, %p146_p3  ;;  %s25_s27 = ssub.s32 %s1885_s18, %s1961_s25 }
   0xb   : > { %s2545_s20 = scalar_select %p1947_p4, 1, 0 }
   0xc   : > { %p1699_p6 = pneg %p1954_p5  ;;  %p1971_p8 = scmp.eq.s32.totalorder %s25_s27, 0 }
   0xd   : > { %s28_s29 = sadd.s32 1, %s1881_s17  ;;  %p35_p9 = scmp.ne.s32.totalorder %s1881_s17, %s1877_s16 }
   0xe   : > { %p1965_p7 = pnand %p1699_p6, %p2543_p1  ;;  %s1768_s30 = scalar_lea.vmem %s163_s23, 16 }
   0xf   : > { %p1769_p10 = scmp.ne.s32.totalorder %s163_s23, %s1768_s30  ;;  %p1776_p0 = scmp.lt.s32.totalorder %s163_s23, %s163_s23 }
  0x10   : > { %p1770_p11 = pneg %p1965_p7  ;;  %p1777_p2 = scmp.lt.s32.totalorder %s1768_s30, %s1768_s30 }
  0x12   : > { %p1771_p12 = pnand %p1770_p11, %p1769_p10  ;;  %p1778_p3 = por %p1777_p2, %p1776_p0 }
  0x14   : > { %p1772_p13 = pneg %p1771_p12 }
  0x16   : > { %p1779_p6 = pnand %p1778_p3, %p1772_p13 }
  0x18   : > { %1782 = shalt.err (!%p1779_p6)
}
  0x19   : > { %s1887_s5 = smov [#allocation7]   ;;  %p36_p10 = scmp.eq.s32.totalorder %s1885_s18, 0 }
  0x1a   : > { %1702 = dma.vmem_to_smem (!%p1965_p7), %s163_s23, 16, %s1887_s5, [#allocation4]  }
  0x1b   : > { %s1985_s6 = scalar_select %p1971_p8, %s1881_s17, %s28_s29  }
  0x1c   : > { %p1711_p11 = scmp.lt.s32.totalorder %s1885_s18, 2  ;;  %s1990_s7 = sand.u32 1, %s1881_s17  }
  0x1d   : > { %s1686_s8 = smul.u32 384, %s1885_s18  ;;  %p37_p12 = por %p36_p10, %p35_p9 }
  0x1e   : > { %s1685_s9 = smul.u32 24, %s1990_s7  ;;  %s174_s22 = scalar_lea.sflag [#allocation3], %s1990_s7 }
  0x1f   : > { %s2000_s12 = scalar_lea.hbm %s2538_s0, %s1686_s8  ;;  %p2002_p7 = pnand %p1711_p11, %p37_p12 }
  0x20   : > { %s1687_s14 = smul.u32 96, %s1990_s7  ;;  %s177_s15 = scalar_lea.vmem [#allocation2], %s1685_s9 }
  0x21   : > { %s185_s21 = sshll.u32 %s177_s15, 4  ;;  %s1783_s23 = scalar_lea.hbm %s2000_s12, 384  ;;  %s2007_s21 = int_to_ptr.vmem [resolvable:$true] %s185_s21 }
  0x22   : > { %p1784_p8 = scmp.ne.s32.totalorder %s2000_s12, %s1783_s23  ;;  %p1785_p9 = pneg %p2002_p7 }
  0x23   : > { %s1788_s28 = scalar_lea.hbm %s2538_s0, 768  ;;  %p1789_p2 = scmp.lt.u32.totalorder %s2000_s12, %s2538_s0 }
  0x24   : > { %p1786_p13 = pnand %p1785_p9, %p1784_p8  ;;  %p1790_p3 = scmp.lt.u32.totalorder %s1788_s28, %s1783_s23 }
  0x25   : > { %p1792_p10 = scmp.lt.u32.totalorder %s1783_s23, %s2000_s12 }
  0x26   : > { %p1787_p0 = pneg %p1786_p13  ;;  %p1791_p6 = por %p1790_p3, %p1789_p2 }
  0x28   : > { %p1793_p11 = por %p1792_p10, %p1791_p6 }
  0x2a   : > { %p1794_p12 = pnand %p1793_p11, %p1787_p0 }
  0x2c   : > { %1797 = shalt.err (!%p1794_p12)
}
  0x2d   : > { %s1798_s5 = scalar_lea.vmem %s2007_s21, 384  ;;  %s1888_s8 = smov [#allocation2]  }
  0x2e   : > { %p1799_p8 = scmp.ne.s32.totalorder %s2007_s21, %s1798_s5  ;;  %s1803_s9 = sshll.u32 %s1888_s8, 4  ;;  %s1804_s9 = int_to_ptr.vmem [resolvable:$false] %s1803_s9 }
  0x2f   : > { %s1805_s10 = scalar_lea.vmem %s1804_s9, 768  ;;  %p1806_p4 = scmp.lt.s32.totalorder %s2007_s21, %s1804_s9 }
  0x30   : > { %p1801_p13 = pnand %p1799_p8, %p1785_p9  ;;  %p1807_p2 = scmp.lt.s32.totalorder %s1805_s10, %s1798_s5 }
  0x32   : > { %p1802_p1 = pneg %p1801_p13  ;;  %p1808_p3 = por %p1807_p2, %p1806_p4 }
  0x34   : > { %p1809_p6 = pnand %p1808_p3, %p1802_p1 }
  0x36   : > { %1812 = shalt.err (!%p1809_p6)
}
  0x37   : > { %1706 = dma.hbm_to_vmem [thread:$0]  (!%p2002_p7), %s2000_s12, 384, %s2007_s21, %s174_s22  }
  0x38   : > { %s1688_s11 = smul.u32 1536, %s1885_s18  ;;  %s196_s15 = scalar_lea.vmem [#allocation5], %s1687_s14 }
  0x39   : > { %s203_s23 = sshll.u32 %s196_s15, 4  ;;  %s193_s29 = scalar_lea.sflag [#allocation6], %s1990_s7  ;;  %s2038_s23 = int_to_ptr.vmem [resolvable:$true] %s203_s23 }
  0x3a   : > { %s2043_s28 = scalar_lea.hbm %s2539_s1, %s1688_s11  ;;  %s1818_s14 = scalar_lea.hbm %s2539_s1, 3072 }
  0x3b   : > { %s1813_s30 = scalar_lea.hbm %s2043_s28, 1536  ;;  %p1819_p10 = scmp.lt.u32.totalorder %s2043_s28, %s2539_s1 }
  0x3c   : > { %p1814_p1 = scmp.ne.s32.totalorder %s2043_s28, %s1813_s30  ;;  %p1820_p11 = scmp.lt.u32.totalorder %s1818_s14, %s1813_s30 }
  0x3d   : > { %p1822_p8 = scmp.lt.u32.totalorder %s1813_s30, %s2043_s28 }
  0x3e   : > { %p1816_p4 = pnand %p1814_p1, %p1785_p9  ;;  %p1821_p12 = por %p1820_p11, %p1819_p10 }
  0x40   : > { %p1817_p0 = pneg %p1816_p4  ;;  %p1823_p13 = por %p1822_p8, %p1821_p12 }
  0x42   : > { %p1824_p2 = pnand %p1823_p13, %p1817_p0 }
  0x44   : > { %1827 = shalt.err (!%p1824_p2)
}
  0x45   : > { %s1828_s5 = scalar_lea.vmem %s2038_s23, 1536  ;;  %s1889_s8 = smov [#allocation5]  }
  0x46   : > { %p1829_p3 = scmp.ne.s32.totalorder %s2038_s23, %s1828_s5  ;;  %s1833_s9 = sshll.u32 %s1889_s8, 4  ;;  %s1834_s9 = int_to_ptr.vmem [resolvable:$false] %s1833_s9 }
  0x47   : > { %s1835_s10 = scalar_lea.vmem %s1834_s9, 3072  ;;  %p1836_p4 = scmp.lt.s32.totalorder %s2038_s23, %s1834_s9 }
  0x48   : > { %p1831_p6 = pnand %p1829_p3, %p1785_p9  ;;  %p1837_p10 = scmp.lt.s32.totalorder %s1835_s10, %s1828_s5 }
  0x4a   : > { %p1832_p1 = pneg %p1831_p6  ;;  %p1838_p11 = por %p1837_p10, %p1836_p4 }
  0x4c   : > { %p1839_p12 = pnand %p1838_p11, %p1832_p1 }
  0x4e   : > { %1842 = shalt.err (!%p1839_p12)
}
  0x4f   : > { %s1890_s11 = smov 384   ;;  %s1891_s15 = smov 24  }
  0x50   : > { %1709 = dma.hbm_to_vmem [thread:$0]  (!%p2002_p7), %s2043_s28, 1536, %s2038_s23, %s193_s29, %s1890_s11, %s1890_s11, %s1891_s15  }
  0x51   : > { %215 = sbr.rel (%p1954_p5) target bundleno = 1558 (0x616), region = 36  ;;  %s217_s26 = sand.u32 (!%p1954_p5), 1, %s1877_s16  }
  0x52   : > { %s1689_s27 = smul.u32 (!%p1954_p5), 24, %s217_s26  ;;  %s218_s30 = scalar_lea.sflag (!%p1954_p5), [#allocation3], %s217_s26 }
  0x53   : > { %p2550_p9 = scmp.ne.s32.totalorder (!%p1954_p5), %s2545_s20, 0 }
  0x54   : > { %s2074_s18 = scalar_lea.vmem (!%p1954_p5), [#allocation2], %s1689_s27 }
  0x58   : > { %1860 = dma.done.wait (%p2550_p9), %s218_s30, 384  }
  0x59   : > { %1862 = vsyncadd (%p2550_p9), %s218_s30, 4294966912  ;;  %s1690_s12 = smul.u32 96, %s217_s26  ;;  %s227_s13 = scalar_lea.sflag [#allocation6], %s217_s26 }
  0x5b   : > { %s230_s7 = scalar_lea.vmem [#allocation5], %s1690_s12 }
  0x5c   : > { %1864 = dma.done.wait (%p2550_p9), %s227_s13, 1536  }
  0x5d   : > { %1866 = vsyncadd (%p2550_p9), %s227_s13, 4294965760  ;;  %p2551_p5 = scmp.eq.s32.totalorder %s1939_s19, 0 }
  0x5f   : > { %1868 = dma.done.wait (%p2551_p5), [#allocation4], 16   ;;  %p2552_p7 = pmov %p2551_p5 }
  0x61   : > { %1870 = vsyncadd (%p2552_p7), [#allocation4], 4294967280 }
  0x62   : > { %239 = sfence }
  0x63   : > { %v2088_v0 = vld [vmem:[%s230_s7] sm:$0xff]  ;;  %v2090_v1 = vld [vmem:[%s230_s7 + $0x8] sm:$0xff]  ;;  %v2092_v2 = vld [vmem:[%s230_s7 + $0x10] sm:$0xff]  ;;  %vm285_vm0 = vcmask 359424   ;;  %v1892_v45 = vmov 0.0|0.0   ;;  %vm1893_vm1 = vmmov 0  }
  0x64   : > { %v292_v3 = vmul.f32 %v2088_v0, %v2088_v0  ;;  %v293_v4 = vmul.f32 %v2090_v1, %v2090_v1  ;;  %v294_v5 = vmul.f32 %v2092_v2, %v2092_v2  ;;  %v2100_v6 = vld [vmem:[%s230_s7 + $0x30] sm:$0xff]  ;;  %v2102_v7 = vld [vmem:[%s230_s7 + $0x38] sm:$0xff]  ;;  %v2104_v8 = vld [vmem:[%s230_s7 + $0x40] sm:$0xff]  ;;  %1676 = vmatprep.subr.bf16.mxu0 %v1892_v45  ;;  %v1894_v46 = vmov 0.0   ;;  %s557_s20 = sld [smem:[#allocation7]]  ;;  %s1630_s24 = sld [smem:[#allocation7 + $0x1]] }
  0x65   : > { %v298_v9 = vmul.f32 %v2100_v6, %v2100_v6  ;;  %v299_v10 = vmul.f32 %v2102_v7, %v2102_v7  ;;  %v300_v11 = vmul.f32 %v2104_v8, %v2104_v8  ;;  %v2112_v12 = vld [vmem:[%s230_s7 + $0x18] sm:$0xff]  ;;  %v2114_v13 = vld [vmem:[%s230_s7 + $0x20] sm:$0xff]  ;;  %v2116_v14 = vld [vmem:[%s230_s7 + $0x28] sm:$0xff]  ;;  %1665 = vmatprep.mubr.msk.f32.mxu0 %vm1893_vm1, %v1894_v46  ;;  %vm543_vm3 = vcmask 64512   ;;  %s1631_s23 = sld [smem:[#allocation7 + $0x2]]  ;;  %s1632_s28 = sld [smem:[#allocation7 + $0x3]] }
  0x66   : > { %v304_v15 = vadd.f32 %v293_v4, %v292_v3  ;;  %v305_v16 = vsel %vm285_vm0, %v294_v5, 0.0  ;;  %v295_v17 = vmul.f32 %v2112_v12, %v2112_v12  ;;  %v296_v18 = vmul.f32 %v2114_v13, %v2114_v13  ;;  %v2123_v19 = vld [vmem:[%s230_s7 + $0x48] sm:$0xff]  ;;  %v279_v20 = vld [vmem:[%s230_s7 + $0x50] sm:$0xff]  ;;  %v2125_v21 = vld [vmem:[%s230_s7 + $0x58] sm:$0xff]  ;;  %s1633_s29 = sld [smem:[#allocation7 + $0x4]]  ;;  %s1634_s14 = sld [smem:[#allocation7 + $0x5]] }
  0x67   : > { %v314_v22 = vadd.f32 %v299_v10, %v298_v9  ;;  %v315_v23 = vsel %vm285_vm0, %v300_v11, 0.0  ;;  %v297_v24 = vmul.f32 %v2116_v14, %v2116_v14  ;;  %v301_v25 = vmul.f32 %v2123_v19, %v2123_v19  ;;  %v2133_v26 = vld [vmem:[%s2074_s18] sm:$0xff]  ;;  %v2136_v27 = vld [vmem:[%s2074_s18 + $0x8] sm:$0xff]  ;;  %v2139_v28 = vld [vmem:[%s2074_s18 + $0x10] sm:$0xff]  ;;  %s1635_s21 = sld [smem:[#allocation7 + $0x6]]  ;;  %s1636_s22 = sld [smem:[#allocation7 + $0x7]] }
  0x68   : > { %v306_v29 = vadd.f32 %v305_v16, %v304_v15  ;;  %v309_v30 = vadd.f32 %v296_v18, %v295_v17  ;;  %v302_v31 = vmul.f32 %v279_v20, %v279_v20  ;;  %v303_v32 = vmul.f32 %v2125_v21, %v2125_v21  ;;  %vm2161_vm2 = vmpackc.low %vm285_vm0, %vm285_vm0  ;;  %s1637_s5 = sld [smem:[#allocation7 + $0x8]]  ;;  %s1638_s8 = sld [smem:[#allocation7 + $0x9]] }
  0x69   : > { %v316_v33 = vadd.f32 %v315_v23, %v314_v22  ;;  %v310_v34 = vsel %vm285_vm0, %v297_v24, 0.0  ;;  %v281_v35 = vmul.f32 %v2133_v26, %v2133_v26  ;;  %v282_v36 = vmul.f32 %v2136_v27, %v2136_v27  ;;  %s1639_s11 = sld [smem:[#allocation7 + $0xa]]  ;;  %s1640_s15 = sld [smem:[#allocation7 + $0xb]] }
  0x6a   : > { %307 = vadd.xlane.f32.xlu0 %v306_v29  ;;  %v311_v37 = vadd.f32 %v310_v34, %v309_v30  ;;  %v319_v38 = vadd.f32 %v302_v31, %v301_v25  ;;  %v320_v39 = vsel %vm285_vm0, %v303_v32, 0.0  ;;  %v283_v40 = vmul.f32 %v2139_v28, %v2139_v28  ;;  %s1641_s26 = sld [smem:[#allocation7 + $0xc]]  ;;  %s1642_s27 = sld [smem:[#allocation7 + $0xd]] }
  0x6b   : > { %317 = vadd.xlane.f32.xlu1 %v316_v33  ;;  %v284_v41 = vadd.f32 %v282_v36, %v281_v35  ;;  %v534_v35 = vlaneseq  ;;  %s1643_s30 = sld [smem:[#allocation7 + $0xe]]  ;;  %s1645_s12 = sld [smem:[#allocation7 + $0x10]] }
  0x6c   : > { %v321_v42 = vadd.f32 %v320_v39, %v319_v38  ;;  %v286_v43 = vsel %vm285_vm0, %v283_v40, 0.0  ;;  %s1646_s13 = sld [smem:[#allocation7 + $0x11]]  ;;  %s1647_s7 = sld [smem:[#allocation7 + $0x12]] }
  0x6d   : > { %v287_v44 = vadd.f32 %v286_v43, %v284_v41  ;;  %v2181_v38 = vshrl.u32 %v534_v35, 7  ;;  %p263_p0 = scmp.lt.s32.totalorder %s1939_s19, 1 }
  0x6e   : > { %312 = vadd.xlane.f32.xlu0 %v311_v37 }
  0x6f   : > { %322 = vadd.xlane.f32.xlu1 %v321_v42  ;;  %v536_v41 = vadd.s32 8, %v2181_v38  ;;  %v537_v42 = vadd.s32 16, %v2181_v38  ;;  %v538_v43 = vadd.s32 24, %v2181_v38  ;;  %v2187_v46 = vcvt.s32.f32 %v2181_v38  ;;  %s2560_s19 = smov (!%p263_p0, %s1939_s19), 1 }
  0x72   : > { %288 = vadd.xlane.f32.xlu0 %v287_v44 }
  0xf7   : > { %v308_v47 = vpop.xlane.xlu0 %307 }
  0xf8   : > { %1751 = vrsqrt.f32 %v308_v47  ;;  %v318_v48 = vpop.xlane.xlu1 %317  ;;  %v2189_v47 = vcvt.s32.f32 %v536_v41 }
  0xf9   : > { %1753 = vrsqrt.f32 %v318_v48  ;;  %v2191_v48 = vcvt.s32.f32 %v537_v42 }
  0xfb   : > { %v313_v49 = vpop.xlane.xlu0 %312 }
  0xfc   : > { %1755 = vrsqrt.f32 %v313_v49  ;;  %v323_v50 = vpop.xlane.xlu1 %322  ;;  %v2193_v49 = vcvt.s32.f32 %v538_v43 }
  0xfd   : > { %1757 = vrsqrt.f32 %v323_v50 }
  0xff   : > { %v289_v51 = vpop.xlane.xlu0 %288 }
 0x100   : > { %1759 = vrsqrt.f32 %v289_v51 }
 0x102   : > { %v1752_v52 = vpop.eup %1751 }
 0x103   : > { %v1754_v53 = vpop.eup %1753  ;;  %v328_v54 = vmin.f32 %v1752_v52, 1e+12 }
 0x104   : > { %v330_v55 = vmin.f32 %v1754_v53, 1e+12 }
 0x105   : > { %v336_v60 = vmul.f32 %v328_v54, %v2090_v1  ;;  %v337_v61 = vmul.f32 %v328_v54, %v2092_v2  ;;  %v335_v4 = vmul.f32 %v328_v54, %v2088_v0 }
 0x106   : > { %v1756_v56 = vpop.eup %1755  ;;  %v342_v62 = vmul.f32 %v330_v55, %v2102_v7 }
 0x107   : > { %v1758_v57 = vpop.eup %1757  ;;  %v329_v58 = vmin.f32 %v1756_v56, 1e+12 }
 0x108   : > { %v331_v59 = vmin.f32 %v1758_v57, 1e+12 }
 0x109   : > { %v339_v63 = vmul.f32 %v329_v58, %v2114_v13  ;;  %v340_v3 = vmul.f32 %v329_v58, %v2116_v14  ;;  %v338_v5 = vmul.f32 %v329_v58, %v2112_v12  ;;  %v343_v12 = vmul.f32 %v330_v55, %v2104_v8 }
 0x10a   : > { %v1760_v9 = vpop.eup %1759  ;;  %v345_v1 = vmul.f32 %v331_v59, %v279_v20  ;;  %v346_v13 = vmul.f32 %v331_v59, %v2125_v21  ;;  %v341_v14 = vmul.f32 %v330_v55, %v2100_v6  ;;  %v344_v17 = vmul.f32 %v331_v59, %v2123_v19 }
 0x10b   : > { %v291_v11 = vmin.f32 %v1760_v9, 1e+12  ;;  %v1668_v2 = vpack.c.bf16 %v339_v63, %v336_v60  ;;  %v1677_v15 = vpack.c.bf16 %v340_v3, %v337_v61  ;;  %v1670_v7 = vpack.c.bf16 %v338_v5, %v335_v4 }
 0x10c   : > { %v1672_v16 = vpack.c.bf16 %v345_v1, %v342_v62  ;;  %v1681_v18 = vpack.c.bf16 %v346_v13, %v343_v12  ;;  %v1674_v20 = vpack.c.bf16 %v344_v17, %v341_v14 }
 0x10d   : > { %1669 = vmatprep.subr.bf16.mxu1 %v1668_v2  ;;  %1679 = vmatpush3.bf16.xpose.msk.msra.mxu0 %vm2161_vm2, %v1677_v15  ;;  %v333_v0 = vmul.f32 %v291_v11, %v2136_v27  ;;  %v334_v22 = vmul.f32 %v291_v11, %v2139_v28  ;;  %v332_v23 = vmul.f32 %v291_v11, %v2133_v26 }
 0x10e   : > { %1671 = vmatpush1.bf16.xpose.msra.mxu1 %v1670_v7  ;;  %1680 = vmatprep.subr.bf16.mxu0 %v1892_v45 }
 0x10f   : > { %1673 = vmatprep.subr.bf16.mxu1 %v1672_v16  ;;  %426 = vmatprep.mubr.f32.mxu1 %v333_v0 }
 0x115   : > { %1683 = vmatpush3.bf16.xpose.msk.msra.mxu0 %vm2161_vm2, %v1681_v18 }
 0x116   : > { %1675 = vmatpush1.bf16.xpose.msra.mxu1 %v1674_v20 }
 0x11c   : > { %1666 = vmatmul.mubr.msk.f32.vlgmr.msra.gmra.mrb[0].mxu0 %vm285_vm0, %v334_v22 }
 0x11d   : > { %427 = vmatmul.mubr.f32.vlgmr.msra.gmra.mrb[0].mxu1 %v332_v23  ;;  %v558_v23 = vstv %s557_s20  ;;  %s1648_s20 = sld [smem:[#allocation7 + $0x13]] }
 0x1ef   : > { %v498_v8 = vpop.f32.mrb[0].mxu0 }
 0x1f0   : > { %v428_v21 = vpop.f32.mrb[0].mxu1  ;;  %v1667_v24 = vpop.f32.mrb[1].mxu0 }
 0x1f1   : > { %v499_v25 = vadd.f32 %v498_v8, %v428_v21  ;;  %v430_v6 = vpop.f32.mrb[1].mxu1  ;;  %v604_v21 = vstv %s1630_s24  ;;  %s1649_s24 = sld [smem:[#allocation7 + $0x14]] }
 0x1f3   : > { %502 = vxpose.xlu1.b32.start.end [1/1] (short) (narrow) %v499_v25, 32 }
 0x273   : > { %v518_v19 = vpop.trf.xlu1 }
 0x274   : > { %v544_v28 = vsel %vm543_vm3, %v518_v19, -inf }
 0x277   : > { %v519_v27 = vpop.trf.xlu1 }
 0x278   : > { %v545_v30 = vsel %vm543_vm3, %v519_v27, -inf }
 0x279   : > { %v548_v33 = vmax.f32 %v544_v28, %v545_v30 }
 0x27b   : > { %v520_v29 = vpop.trf.xlu1 }
 0x27c   : > { %v546_v26 = vsel %vm543_vm3, %v520_v29, -inf }
 0x27f   : > { %v521_v31 = vpop.trf.xlu1 }
 0x280   : > { %v547_v32 = vsel %vm543_vm3, %v521_v31, -inf }
 0x281   : > { %v549_v34 = vmax.f32 %v546_v26, %v547_v32 }
 0x283   : > { %v550_v36 = vmax.f32 %v548_v33, %v549_v34 }
 0x285   : > { %v551_v37 = vrot.slane %v550_v36, 4 }
 0x287   : > { %v552_v39 = vmax.f32 %v550_v36, %v551_v37 }
 0x289   : > { %v553_v40 = vrot.slane %v552_v39, 2 }
 0x28b   : > { %v554_v44 = vmax.f32 %v552_v39, %v553_v40 }
 0x28d   : > { %v555_v45 = vrot.slane %v554_v44, 1 }
 0x28f   : > { %v556_v50 = vmax.f32 %v554_v44, %v555_v45 }
 0x291   : > { %vm561_vm4 = vcmp.eq.f32.partialorder %v518_v19, %v556_v50  ;;  %vm562_vm5 = vcmp.eq.f32.partialorder %v519_v27, %v556_v50  ;;  %vm563_vm6 = vcmp.eq.f32.partialorder %v520_v29, %v556_v50  ;;  %vm564_vm7 = vcmp.eq.f32.partialorder %v521_v31, %v556_v50 }
 0x292   : > { %v565_v51 = vsel %vm561_vm4, %v2187_v46, 32.0  ;;  %v566_v52 = vsel %vm562_vm5, %v2189_v47, 32.0  ;;  %v567_v53 = vsel %vm563_vm6, %v2191_v48, 32.0  ;;  %v568_v54 = vsel %vm564_vm7, %v2193_v49, 32.0 }
 0x293   : > { %v569_v55 = vsel %vm543_vm3, %v565_v51, inf  ;;  %v570_v56 = vsel %vm543_vm3, %v566_v52, inf  ;;  %v571_v57 = vsel %vm543_vm3, %v567_v53, inf  ;;  %v572_v58 = vsel %vm543_vm3, %v568_v54, inf }
 0x294   : > { %v573_v59 = vmin.f32 %v569_v55, %v570_v56  ;;  %v574_v60 = vmin.f32 %v571_v57, %v572_v58  ;;  %v559_v25 = vmul.f32 %v558_v23, %v556_v50 }
 0x296   : > { %v575_v61 = vmin.f32 %v573_v59, %v574_v60 }
 0x298   : > { %v576_v62 = vrot.slane %v575_v61, 4 }
 0x29a   : > { %v577_v63 = vmin.f32 %v575_v61, %v576_v62 }
 0x29c   : > { %v578_v3 = vrot.slane %v577_v63, 2 }
 0x29e   : > { %v579_v4 = vmin.f32 %v577_v63, %v578_v3  ;;  %v650_v3 = vstv %s1631_s23 }
 0x2a0   : > { %v580_v5 = vrot.slane %v579_v4, 1 }
 0x2a2   : > { %v581_v9 = vmin.f32 %v579_v4, %v580_v5 }
 0x2a4   : > { %vm582_vm8 = vcmp.eq.f32.partialorder %v2187_v46, %v581_v9  ;;  %vm583_vm9 = vcmp.eq.f32.partialorder %v2189_v47, %v581_v9  ;;  %vm584_vm10 = vcmp.eq.f32.partialorder %v2191_v48, %v581_v9  ;;  %vm585_vm11 = vcmp.eq.f32.partialorder %v2193_v49, %v581_v9 }
 0x2a5   : > { %v586_v10 = vsel %vm582_vm8, -3e+38, %v518_v19  ;;  %v587_v1 = vsel %vm583_vm9, -3e+38, %v519_v27  ;;  %v588_v11 = vsel %vm584_vm10, -3e+38, %v520_v29 }
 0x2a6   : > { %v589_v2 = vsel %vm585_vm11, -3e+38, %v521_v31  ;;  %v590_v15 = vsel %vm543_vm3, %v586_v10, -inf  ;;  %v591_v7 = vsel %vm543_vm3, %v587_v1, -inf  ;;  %v592_v16 = vsel %vm543_vm3, %v588_v11, -inf }
 0x2a7   : > { %v593_v0 = vsel %vm543_vm3, %v589_v2, -inf  ;;  %v594_v12 = vmax.f32 %v590_v15, %v591_v7 }
 0x2a8   : > { %v595_v13 = vmax.f32 %v592_v16, %v593_v0 }
 0x2aa   : > { %v596_v14 = vmax.f32 %v594_v12, %v595_v13 }
 0x2ac   : > { %v597_v17 = vrot.slane %v596_v14, 4 }
 0x2ae   : > { %v598_v18 = vmax.f32 %v596_v14, %v597_v17 }
 0x2b0   : > { %v599_v20 = vrot.slane %v598_v18, 2 }
 0x2b2   : > { %v600_v22 = vmax.f32 %v598_v18, %v599_v20 }
 0x2b4   : > { %v601_v8 = vrot.slane %v600_v22, 1 }
 0x2b6   : > { %v602_v24 = vmax.f32 %v600_v22, %v601_v8 }
 0x2b8   : > { %v605_v6 = vmul.f32 %v604_v21, %v602_v24  ;;  %vm607_vm12 = vcmp.eq.f32.partialorder %v586_v10, %v602_v24  ;;  %vm608_vm13 = vcmp.eq.f32.partialorder %v587_v1, %v602_v24  ;;  %vm609_vm14 = vcmp.eq.f32.partialorder %v588_v11, %v602_v24 }
 0x2b9   : > { %vm610_vm15 = vcmp.eq.f32.partialorder %v589_v2, %v602_v24  ;;  %v611_v19 = vsel %vm607_vm12, %v2187_v46, 32.0  ;;  %v612_v27 = vsel %vm608_vm13, %v2189_v47, 32.0  ;;  %v613_v29 = vsel %vm609_vm14, %v2191_v48, 32.0 }
 0x2ba   : > { %v606_v30 = vadd.f32 %v605_v6, %v559_v25  ;;  %v614_v31 = vsel %vm610_vm15, %v2193_v49, 32.0  ;;  %v615_v28 = vsel %vm543_vm3, %v611_v19, inf  ;;  %v616_v26 = vsel %vm543_vm3, %v612_v27, inf }
 0x2bb   : > { %v617_v32 = vsel %vm543_vm3, %v613_v29, inf  ;;  %v618_v33 = vsel %vm543_vm3, %v614_v31, inf  ;;  %v619_v34 = vmin.f32 %v615_v28, %v616_v26 }
 0x2bc   : > { %v620_v35 = vmin.f32 %v617_v32, %v618_v33 }
 0x2be   : > { %v621_v36 = vmin.f32 %v619_v34, %v620_v35 }
 0x2c0   : > { %v622_v37 = vrot.slane %v621_v36, 4 }
 0x2c2   : > { %v623_v39 = vmin.f32 %v621_v36, %v622_v37  ;;  %v696_v37 = vstv %s1632_s28 }
 0x2c4   : > { %v624_v40 = vrot.slane %v623_v39, 2 }
 0x2c6   : > { %v625_v41 = vmin.f32 %v623_v39, %v624_v40 }
 0x2c8   : > { %v626_v42 = vrot.slane %v625_v41, 1 }
 0x2ca   : > { %v627_v43 = vmin.f32 %v625_v41, %v626_v42 }
 0x2cc   : > { %vm628_vm1 = vcmp.eq.f32.partialorder %v2187_v46, %v627_v43  ;;  %vm629_vm2 = vcmp.eq.f32.partialorder %v2189_v47, %v627_v43  ;;  %vm630_vm4 = vcmp.eq.f32.partialorder %v2191_v48, %v627_v43  ;;  %vm631_vm5 = vcmp.eq.f32.partialorder %v2193_v49, %v627_v43 }
 0x2cd   : > { %v632_v44 = vsel %vm628_vm1, -3e+38, %v586_v10  ;;  %v633_v45 = vsel %vm629_vm2, -3e+38, %v587_v1  ;;  %v634_v50 = vsel %vm630_vm4, -3e+38, %v588_v11 }
 0x2ce   : > { %v635_v51 = vsel %vm631_vm5, -3e+38, %v589_v2  ;;  %v636_v52 = vsel %vm543_vm3, %v632_v44, -inf  ;;  %v637_v53 = vsel %vm543_vm3, %v633_v45, -inf  ;;  %v638_v54 = vsel %vm543_vm3, %v634_v50, -inf }
 0x2cf   : > { %v639_v55 = vsel %vm543_vm3, %v635_v51, -inf  ;;  %v640_v56 = vmax.f32 %v636_v52, %v637_v53 }
 0x2d0   : > { %v641_v57 = vmax.f32 %v638_v54, %v639_v55 }
 0x2d2   : > { %v642_v58 = vmax.f32 %v640_v56, %v641_v57 }
 0x2d4   : > { %v643_v59 = vrot.slane %v642_v58, 4 }
 0x2d6   : > { %v644_v60 = vmax.f32 %v642_v58, %v643_v59 }
 0x2d8   : > { %v645_v61 = vrot.slane %v644_v60, 2 }
 0x2da   : > { %v646_v62 = vmax.f32 %v644_v60, %v645_v61 }
 0x2dc   : > { %v647_v63 = vrot.slane %v646_v62, 1 }
 0x2de   : > { %v648_v4 = vmax.f32 %v646_v62, %v647_v63 }
 0x2e0   : > { %v651_v5 = vmul.f32 %v650_v3, %v648_v4  ;;  %vm653_vm6 = vcmp.eq.f32.partialorder %v632_v44, %v648_v4  ;;  %vm654_vm7 = vcmp.eq.f32.partialorder %v633_v45, %v648_v4  ;;  %vm655_vm8 = vcmp.eq.f32.partialorder %v634_v50, %v648_v4 }
 0x2e1   : > { %vm656_vm9 = vcmp.eq.f32.partialorder %v635_v51, %v648_v4  ;;  %v657_v9 = vsel %vm653_vm6, %v2187_v46, 32.0  ;;  %v658_v10 = vsel %vm654_vm7, %v2189_v47, 32.0  ;;  %v659_v1 = vsel %vm655_vm8, %v2191_v48, 32.0 }
 0x2e2   : > { %v652_v11 = vadd.f32 %v651_v5, %v606_v30  ;;  %v660_v2 = vsel %vm656_vm9, %v2193_v49, 32.0  ;;  %v661_v15 = vsel %vm543_vm3, %v657_v9, inf  ;;  %v662_v7 = vsel %vm543_vm3, %v658_v10, inf }
 0x2e3   : > { %v663_v16 = vsel %vm543_vm3, %v659_v1, inf  ;;  %v664_v0 = vsel %vm543_vm3, %v660_v2, inf  ;;  %v665_v12 = vmin.f32 %v661_v15, %v662_v7 }
 0x2e4   : > { %v666_v13 = vmin.f32 %v663_v16, %v664_v0 }
 0x2e6   : > { %v667_v14 = vmin.f32 %v665_v12, %v666_v13 }
 0x2e8   : > { %v668_v17 = vrot.slane %v667_v14, 4 }
 0x2ea   : > { %v669_v18 = vmin.f32 %v667_v14, %v668_v17  ;;  %v742_v17 = vstv %s1633_s29  ;;  %s265_s29 = scalar_lea.vmem %s2542_s4, %s2560_s19 }
 0x2ec   : > { %v670_v20 = vrot.slane %v669_v18, 2 }
 0x2ee   : > { %v671_v22 = vmin.f32 %v669_v18, %v670_v20 }
 0x2f0   : > { %v672_v23 = vrot.slane %v671_v22, 1 }
 0x2f2   : > { %v673_v8 = vmin.f32 %v671_v22, %v672_v23 }
 0x2f4   : > { %vm674_vm10 = vcmp.eq.f32.partialorder %v2187_v46, %v673_v8  ;;  %vm675_vm11 = vcmp.eq.f32.partialorder %v2189_v47, %v673_v8  ;;  %vm676_vm12 = vcmp.eq.f32.partialorder %v2191_v48, %v673_v8  ;;  %vm677_vm13 = vcmp.eq.f32.partialorder %v2193_v49, %v673_v8 }
 0x2f5   : > { %v678_v21 = vsel %vm674_vm10, -3e+38, %v632_v44  ;;  %v679_v24 = vsel %vm675_vm11, -3e+38, %v633_v45  ;;  %v680_v25 = vsel %vm676_vm12, -3e+38, %v634_v50 }
 0x2f6   : > { %v681_v6 = vsel %vm677_vm13, -3e+38, %v635_v51  ;;  %v682_v19 = vsel %vm543_vm3, %v678_v21, -inf  ;;  %v683_v27 = vsel %vm543_vm3, %v679_v24, -inf  ;;  %v684_v29 = vsel %vm543_vm3, %v680_v25, -inf }
 0x2f7   : > { %v685_v30 = vsel %vm543_vm3, %v681_v6, -inf  ;;  %v686_v31 = vmax.f32 %v682_v19, %v683_v27 }
 0x2f8   : > { %v687_v28 = vmax.f32 %v684_v29, %v685_v30 }
 0x2fa   : > { %v688_v26 = vmax.f32 %v686_v31, %v687_v28 }
 0x2fc   : > { %v689_v32 = vrot.slane %v688_v26, 4 }
 0x2fe   : > { %v690_v33 = vmax.f32 %v688_v26, %v689_v32 }
 0x300   : > { %v691_v34 = vrot.slane %v690_v33, 2 }
 0x302   : > { %v692_v35 = vmax.f32 %v690_v33, %v691_v34 }
 0x304   : > { %v693_v36 = vrot.slane %v692_v35, 1 }
 0x306   : > { %v694_v39 = vmax.f32 %v692_v35, %v693_v36 }
 0x308   : > { %v697_v40 = vmul.f32 %v696_v37, %v694_v39  ;;  %vm699_vm14 = vcmp.eq.f32.partialorder %v678_v21, %v694_v39  ;;  %vm700_vm15 = vcmp.eq.f32.partialorder %v679_v24, %v694_v39  ;;  %vm701_vm1 = vcmp.eq.f32.partialorder %v680_v25, %v694_v39 }
 0x309   : > { %vm702_vm2 = vcmp.eq.f32.partialorder %v681_v6, %v694_v39  ;;  %v703_v41 = vsel %vm699_vm14, %v2187_v46, 32.0  ;;  %v704_v42 = vsel %vm700_vm15, %v2189_v47, 32.0  ;;  %v705_v43 = vsel %vm701_vm1, %v2191_v48, 32.0 }
 0x30a   : > { %v698_v44 = vadd.f32 %v697_v40, %v652_v11  ;;  %v706_v45 = vsel %vm702_vm2, %v2193_v49, 32.0  ;;  %v707_v50 = vsel %vm543_vm3, %v703_v41, inf  ;;  %v708_v51 = vsel %vm543_vm3, %v704_v42, inf }
 0x30b   : > { %v709_v52 = vsel %vm543_vm3, %v705_v43, inf  ;;  %v710_v53 = vsel %vm543_vm3, %v706_v45, inf  ;;  %v711_v54 = vmin.f32 %v707_v50, %v708_v51 }
 0x30c   : > { %v712_v55 = vmin.f32 %v709_v52, %v710_v53 }
 0x30e   : > { %v713_v56 = vmin.f32 %v711_v54, %v712_v55 }
 0x310   : > { %v714_v57 = vrot.slane %v713_v56, 4 }
 0x312   : > { %v715_v58 = vmin.f32 %v713_v56, %v714_v57 }
 0x314   : > { %v716_v59 = vrot.slane %v715_v58, 2 }
 0x316   : > { %v717_v60 = vmin.f32 %v715_v58, %v716_v59  ;;  %v788_v58 = vstv %s1634_s14 }
 0x318   : > { %v718_v61 = vrot.slane %v717_v60, 1 }
 0x31a   : > { %v719_v62 = vmin.f32 %v717_v60, %v718_v61 }
 0x31c   : > { %vm720_vm4 = vcmp.eq.f32.partialorder %v2187_v46, %v719_v62  ;;  %vm721_vm5 = vcmp.eq.f32.partialorder %v2189_v47, %v719_v62  ;;  %vm722_vm6 = vcmp.eq.f32.partialorder %v2191_v48, %v719_v62  ;;  %vm723_vm7 = vcmp.eq.f32.partialorder %v2193_v49, %v719_v62 }
 0x31d   : > { %v724_v63 = vsel %vm720_vm4, -3e+38, %v678_v21  ;;  %v725_v3 = vsel %vm721_vm5, -3e+38, %v679_v24  ;;  %v726_v4 = vsel %vm722_vm6, -3e+38, %v680_v25 }
 0x31e   : > { %v727_v5 = vsel %vm723_vm7, -3e+38, %v681_v6  ;;  %v728_v9 = vsel %vm543_vm3, %v724_v63, -inf  ;;  %v729_v10 = vsel %vm543_vm3, %v725_v3, -inf  ;;  %v730_v1 = vsel %vm543_vm3, %v726_v4, -inf }
 0x31f   : > { %v731_v11 = vsel %vm543_vm3, %v727_v5, -inf  ;;  %v732_v2 = vmax.f32 %v728_v9, %v729_v10 }
 0x320   : > { %v733_v15 = vmax.f32 %v730_v1, %v731_v11 }
 0x322   : > { %v734_v7 = vmax.f32 %v732_v2, %v733_v15 }
 0x324   : > { %v735_v16 = vrot.slane %v734_v7, 4 }
 0x326   : > { %v736_v0 = vmax.f32 %v734_v7, %v735_v16 }
 0x328   : > { %v737_v12 = vrot.slane %v736_v0, 2 }
 0x32a   : > { %v738_v13 = vmax.f32 %v736_v0, %v737_v12 }
 0x32c   : > { %v739_v14 = vrot.slane %v738_v13, 1 }
 0x32e   : > { %v740_v18 = vmax.f32 %v738_v13, %v739_v14 }
 0x330   : > { %v743_v20 = vmul.f32 %v742_v17, %v740_v18  ;;  %vm745_vm8 = vcmp.eq.f32.partialorder %v724_v63, %v740_v18  ;;  %vm746_vm9 = vcmp.eq.f32.partialorder %v725_v3, %v740_v18  ;;  %vm747_vm10 = vcmp.eq.f32.partialorder %v726_v4, %v740_v18 }
 0x331   : > { %vm748_vm11 = vcmp.eq.f32.partialorder %v727_v5, %v740_v18  ;;  %v749_v22 = vsel %vm745_vm8, %v2187_v46, 32.0  ;;  %v750_v23 = vsel %vm746_vm9, %v2189_v47, 32.0  ;;  %v751_v8 = vsel %vm747_vm10, %v2191_v48, 32.0 }
 0x332   : > { %v744_v21 = vadd.f32 %v743_v20, %v698_v44  ;;  %v752_v24 = vsel %vm748_vm11, %v2193_v49, 32.0  ;;  %v753_v25 = vsel %vm543_vm3, %v749_v22, inf  ;;  %v754_v6 = vsel %vm543_vm3, %v750_v23, inf }
 0x333   : > { %v755_v19 = vsel %vm543_vm3, %v751_v8, inf  ;;  %v756_v27 = vsel %vm543_vm3, %v752_v24, inf  ;;  %v757_v29 = vmin.f32 %v753_v25, %v754_v6 }
 0x334   : > { %v758_v30 = vmin.f32 %v755_v19, %v756_v27 }
 0x336   : > { %v759_v31 = vmin.f32 %v757_v29, %v758_v30 }
 0x338   : > { %v760_v28 = vrot.slane %v759_v31, 4 }
 0x33a   : > { %v761_v26 = vmin.f32 %v759_v31, %v760_v28 }
 0x33c   : > { %v762_v32 = vrot.slane %v761_v26, 2 }
 0x33e   : > { %v763_v33 = vmin.f32 %v761_v26, %v762_v32  ;;  %v834_v26 = vstv %s1635_s21 }
 0x340   : > { %v764_v34 = vrot.slane %v763_v33, 1 }
 0x342   : > { %v765_v35 = vmin.f32 %v763_v33, %v764_v34 }
 0x344   : > { %vm766_vm12 = vcmp.eq.f32.partialorder %v2187_v46, %v765_v35  ;;  %vm767_vm13 = vcmp.eq.f32.partialorder %v2189_v47, %v765_v35  ;;  %vm768_vm14 = vcmp.eq.f32.partialorder %v2191_v48, %v765_v35  ;;  %vm769_vm15 = vcmp.eq.f32.partialorder %v2193_v49, %v765_v35 }
 0x345   : > { %v770_v36 = vsel %vm766_vm12, -3e+38, %v724_v63  ;;  %v771_v37 = vsel %vm767_vm13, -3e+38, %v725_v3  ;;  %v772_v39 = vsel %vm768_vm14, -3e+38, %v726_v4 }
 0x346   : > { %v773_v40 = vsel %vm769_vm15, -3e+38, %v727_v5  ;;  %v774_v41 = vsel %vm543_vm3, %v770_v36, -inf  ;;  %v775_v42 = vsel %vm543_vm3, %v771_v37, -inf  ;;  %v776_v43 = vsel %vm543_vm3, %v772_v39, -inf }
 0x347   : > { %v777_v44 = vsel %vm543_vm3, %v773_v40, -inf  ;;  %v778_v45 = vmax.f32 %v774_v41, %v775_v42 }
 0x348   : > { %v779_v50 = vmax.f32 %v776_v43, %v777_v44 }
 0x34a   : > { %v780_v51 = vmax.f32 %v778_v45, %v779_v50 }
 0x34c   : > { %v781_v52 = vrot.slane %v780_v51, 4 }
 0x34e   : > { %v782_v53 = vmax.f32 %v780_v51, %v781_v52 }
 0x350   : > { %v783_v54 = vrot.slane %v782_v53, 2 }
 0x352   : > { %v784_v55 = vmax.f32 %v782_v53, %v783_v54 }
 0x354   : > { %v785_v56 = vrot.slane %v784_v55, 1 }
 0x356   : > { %v786_v57 = vmax.f32 %v784_v55, %v785_v56 }
 0x358   : > { %vm791_vm1 = vcmp.eq.f32.partialorder %v770_v36, %v786_v57  ;;  %vm792_vm2 = vcmp.eq.f32.partialorder %v771_v37, %v786_v57  ;;  %vm793_vm4 = vcmp.eq.f32.partialorder %v772_v39, %v786_v57  ;;  %vm794_vm5 = vcmp.eq.f32.partialorder %v773_v40, %v786_v57 }
 0x359   : > { %v795_v59 = vsel %vm791_vm1, %v2187_v46, 32.0  ;;  %v796_v60 = vsel %vm792_vm2, %v2189_v47, 32.0  ;;  %v797_v61 = vsel %vm793_vm4, %v2191_v48, 32.0  ;;  %v798_v62 = vsel %vm794_vm5, %v2193_v49, 32.0 }
 0x35a   : > { %v799_v63 = vsel %vm543_vm3, %v795_v59, inf  ;;  %v800_v3 = vsel %vm543_vm3, %v796_v60, inf  ;;  %v801_v4 = vsel %vm543_vm3, %v797_v61, inf  ;;  %v802_v5 = vsel %vm543_vm3, %v798_v62, inf }
 0x35b   : > { %v803_v9 = vmin.f32 %v799_v63, %v800_v3  ;;  %v804_v10 = vmin.f32 %v801_v4, %v802_v5  ;;  %v789_v1 = vmul.f32 %v788_v58, %v786_v57 }
 0x35d   : > { %v805_v11 = vmin.f32 %v803_v9, %v804_v10  ;;  %v790_v2 = vadd.f32 %v789_v1, %v744_v21 }
 0x35f   : > { %v806_v15 = vrot.slane %v805_v11, 4 }
 0x361   : > { %v807_v7 = vmin.f32 %v805_v11, %v806_v15 }
 0x363   : > { %v808_v16 = vrot.slane %v807_v7, 2 }
 0x365   : > { %v809_v0 = vmin.f32 %v807_v7, %v808_v16  ;;  %v880_v7 = vstv %s1636_s22 }
 0x367   : > { %v810_v12 = vrot.slane %v809_v0, 1 }
 0x369   : > { %v811_v13 = vmin.f32 %v809_v0, %v810_v12 }
 0x36b   : > { %vm812_vm6 = vcmp.eq.f32.partialorder %v2187_v46, %v811_v13  ;;  %vm813_vm7 = vcmp.eq.f32.partialorder %v2189_v47, %v811_v13  ;;  %vm814_vm8 = vcmp.eq.f32.partialorder %v2191_v48, %v811_v13  ;;  %vm815_vm9 = vcmp.eq.f32.partialorder %v2193_v49, %v811_v13 }
 0x36c   : > { %v816_v14 = vsel %vm812_vm6, -3e+38, %v770_v36  ;;  %v817_v17 = vsel %vm813_vm7, -3e+38, %v771_v37  ;;  %v818_v18 = vsel %vm814_vm8, -3e+38, %v772_v39 }
 0x36d   : > { %v819_v20 = vsel %vm815_vm9, -3e+38, %v773_v40  ;;  %v820_v22 = vsel %vm543_vm3, %v816_v14, -inf  ;;  %v821_v23 = vsel %vm543_vm3, %v817_v17, -inf  ;;  %v822_v8 = vsel %vm543_vm3, %v818_v18, -inf }
 0x36e   : > { %v823_v21 = vsel %vm543_vm3, %v819_v20, -inf  ;;  %v824_v24 = vmax.f32 %v820_v22, %v821_v23 }
 0x36f   : > { %v825_v25 = vmax.f32 %v822_v8, %v823_v21 }
 0x371   : > { %v826_v6 = vmax.f32 %v824_v24, %v825_v25 }
 0x373   : > { %v827_v19 = vrot.slane %v826_v6, 4 }
 0x375   : > { %v828_v27 = vmax.f32 %v826_v6, %v827_v19 }
 0x377   : > { %v829_v29 = vrot.slane %v828_v27, 2 }
 0x379   : > { %v830_v30 = vmax.f32 %v828_v27, %v829_v29 }
 0x37b   : > { %v831_v31 = vrot.slane %v830_v30, 1 }
 0x37d   : > { %v832_v28 = vmax.f32 %v830_v30, %v831_v31 }
 0x37f   : > { %vm837_vm10 = vcmp.eq.f32.partialorder %v816_v14, %v832_v28  ;;  %vm838_vm11 = vcmp.eq.f32.partialorder %v817_v17, %v832_v28  ;;  %vm839_vm12 = vcmp.eq.f32.partialorder %v818_v18, %v832_v28  ;;  %vm840_vm13 = vcmp.eq.f32.partialorder %v819_v20, %v832_v28 }
 0x380   : > { %v841_v32 = vsel %vm837_vm10, %v2187_v46, 32.0  ;;  %v842_v33 = vsel %vm838_vm11, %v2189_v47, 32.0  ;;  %v843_v34 = vsel %vm839_vm12, %v2191_v48, 32.0  ;;  %v844_v35 = vsel %vm840_vm13, %v2193_v49, 32.0 }
 0x381   : > { %v845_v36 = vsel %vm543_vm3, %v841_v32, inf  ;;  %v846_v37 = vsel %vm543_vm3, %v842_v33, inf  ;;  %v847_v39 = vsel %vm543_vm3, %v843_v34, inf  ;;  %v848_v40 = vsel %vm543_vm3, %v844_v35, inf }
 0x382   : > { %v849_v41 = vmin.f32 %v845_v36, %v846_v37  ;;  %v850_v42 = vmin.f32 %v847_v39, %v848_v40  ;;  %v835_v43 = vmul.f32 %v834_v26, %v832_v28 }
 0x384   : > { %v851_v44 = vmin.f32 %v849_v41, %v850_v42  ;;  %v836_v45 = vadd.f32 %v835_v43, %v790_v2 }
 0x386   : > { %v852_v50 = vrot.slane %v851_v44, 4 }
 0x388   : > { %v853_v51 = vmin.f32 %v851_v44, %v852_v50 }
 0x38a   : > { %v854_v52 = vrot.slane %v853_v51, 2 }
 0x38c   : > { %v855_v53 = vmin.f32 %v853_v51, %v854_v52  ;;  %v926_v51 = vstv %s1637_s5 }
 0x38e   : > { %v856_v54 = vrot.slane %v855_v53, 1 }
 0x390   : > { %v857_v55 = vmin.f32 %v855_v53, %v856_v54 }
 0x392   : > { %vm858_vm14 = vcmp.eq.f32.partialorder %v2187_v46, %v857_v55  ;;  %vm859_vm15 = vcmp.eq.f32.partialorder %v2189_v47, %v857_v55  ;;  %vm860_vm1 = vcmp.eq.f32.partialorder %v2191_v48, %v857_v55  ;;  %vm861_vm2 = vcmp.eq.f32.partialorder %v2193_v49, %v857_v55 }
 0x393   : > { %v862_v56 = vsel %vm858_vm14, -3e+38, %v816_v14  ;;  %v863_v57 = vsel %vm859_vm15, -3e+38, %v817_v17  ;;  %v864_v58 = vsel %vm860_vm1, -3e+38, %v818_v18 }
 0x394   : > { %v865_v59 = vsel %vm861_vm2, -3e+38, %v819_v20  ;;  %v866_v60 = vsel %vm543_vm3, %v862_v56, -inf  ;;  %v867_v61 = vsel %vm543_vm3, %v863_v57, -inf  ;;  %v868_v62 = vsel %vm543_vm3, %v864_v58, -inf }
 0x395   : > { %v869_v63 = vsel %vm543_vm3, %v865_v59, -inf  ;;  %v870_v3 = vmax.f32 %v866_v60, %v867_v61 }
 0x396   : > { %v871_v4 = vmax.f32 %v868_v62, %v869_v63 }
 0x398   : > { %v872_v5 = vmax.f32 %v870_v3, %v871_v4 }
 0x39a   : > { %v873_v9 = vrot.slane %v872_v5, 4 }
 0x39c   : > { %v874_v10 = vmax.f32 %v872_v5, %v873_v9 }
 0x39e   : > { %v875_v1 = vrot.slane %v874_v10, 2 }
 0x3a0   : > { %v876_v11 = vmax.f32 %v874_v10, %v875_v1 }
 0x3a2   : > { %v877_v2 = vrot.slane %v876_v11, 1 }
 0x3a4   : > { %v878_v15 = vmax.f32 %v876_v11, %v877_v2 }
 0x3a6   : > { %vm883_vm4 = vcmp.eq.f32.partialorder %v862_v56, %v878_v15  ;;  %vm884_vm5 = vcmp.eq.f32.partialorder %v863_v57, %v878_v15  ;;  %vm885_vm6 = vcmp.eq.f32.partialorder %v864_v58, %v878_v15  ;;  %vm886_vm7 = vcmp.eq.f32.partialorder %v865_v59, %v878_v15 }
 0x3a7   : > { %v887_v16 = vsel %vm883_vm4, %v2187_v46, 32.0  ;;  %v888_v0 = vsel %vm884_vm5, %v2189_v47, 32.0  ;;  %v889_v12 = vsel %vm885_vm6, %v2191_v48, 32.0  ;;  %v890_v13 = vsel %vm886_vm7, %v2193_v49, 32.0 }
 0x3a8   : > { %v891_v14 = vsel %vm543_vm3, %v887_v16, inf  ;;  %v892_v17 = vsel %vm543_vm3, %v888_v0, inf  ;;  %v893_v18 = vsel %vm543_vm3, %v889_v12, inf  ;;  %v894_v20 = vsel %vm543_vm3, %v890_v13, inf }
 0x3a9   : > { %v895_v22 = vmin.f32 %v891_v14, %v892_v17  ;;  %v896_v23 = vmin.f32 %v893_v18, %v894_v20  ;;  %v881_v8 = vmul.f32 %v880_v7, %v878_v15 }
 0x3ab   : > { %v897_v21 = vmin.f32 %v895_v22, %v896_v23  ;;  %v882_v24 = vadd.f32 %v881_v8, %v836_v45 }
 0x3ad   : > { %v898_v25 = vrot.slane %v897_v21, 4 }
 0x3af   : > { %v899_v6 = vmin.f32 %v897_v21, %v898_v25 }
 0x3b1   : > { %v900_v19 = vrot.slane %v899_v6, 2 }
 0x3b3   : > { %v901_v27 = vmin.f32 %v899_v6, %v900_v19  ;;  %v972_v6 = vstv %s1638_s8 }
 0x3b5   : > { %v902_v29 = vrot.slane %v901_v27, 1 }
 0x3b7   : > { %v903_v30 = vmin.f32 %v901_v27, %v902_v29 }
 0x3b9   : > { %vm904_vm8 = vcmp.eq.f32.partialorder %v2187_v46, %v903_v30  ;;  %vm905_vm9 = vcmp.eq.f32.partialorder %v2189_v47, %v903_v30  ;;  %vm906_vm10 = vcmp.eq.f32.partialorder %v2191_v48, %v903_v30  ;;  %vm907_vm11 = vcmp.eq.f32.partialorder %v2193_v49, %v903_v30 }
 0x3ba   : > { %v908_v31 = vsel %vm904_vm8, -3e+38, %v862_v56  ;;  %v909_v28 = vsel %vm905_vm9, -3e+38, %v863_v57  ;;  %v910_v26 = vsel %vm906_vm10, -3e+38, %v864_v58 }
 0x3bb   : > { %v911_v32 = vsel %vm907_vm11, -3e+38, %v865_v59  ;;  %v912_v33 = vsel %vm543_vm3, %v908_v31, -inf  ;;  %v913_v34 = vsel %vm543_vm3, %v909_v28, -inf  ;;  %v914_v35 = vsel %vm543_vm3, %v910_v26, -inf }
 0x3bc   : > { %v915_v36 = vsel %vm543_vm3, %v911_v32, -inf  ;;  %v916_v37 = vmax.f32 %v912_v33, %v913_v34 }
 0x3bd   : > { %v917_v39 = vmax.f32 %v914_v35, %v915_v36 }
 0x3bf   : > { %v918_v40 = vmax.f32 %v916_v37, %v917_v39 }
 0x3c1   : > { %v919_v41 = vrot.slane %v918_v40, 4 }
 0x3c3   : > { %v920_v42 = vmax.f32 %v918_v40, %v919_v41  ;;  %v1467_v41 = vld [vmem:[%s2540_s2] sm:$0x7] }
 0x3c5   : > { %v921_v43 = vrot.slane %v920_v42, 2 }
 0x3c7   : > { %v922_v44 = vmax.f32 %v920_v42, %v921_v43  ;;  %v1471_v42 = vsub.s32 0, %v2181_v38  ;;  %v1475_v43 = vsub.s32 1, %v2181_v38 }
 0x3c9   : > { %v923_v45 = vrot.slane %v922_v44, 1 }
 0x3cb   : > { %v924_v50 = vmax.f32 %v922_v44, %v923_v45  ;;  %v1479_v44 = vsub.s32 2, %v2181_v38 }
 0x3cd   : > { %vm929_vm12 = vcmp.eq.f32.partialorder %v908_v31, %v924_v50  ;;  %vm930_vm13 = vcmp.eq.f32.partialorder %v909_v28, %v924_v50  ;;  %vm931_vm14 = vcmp.eq.f32.partialorder %v910_v26, %v924_v50  ;;  %vm932_vm15 = vcmp.eq.f32.partialorder %v911_v32, %v924_v50 }
 0x3ce   : > { %v933_v52 = vsel %vm929_vm12, %v2187_v46, 32.0  ;;  %v934_v53 = vsel %vm930_vm13, %v2189_v47, 32.0  ;;  %v935_v54 = vsel %vm931_vm14, %v2191_v48, 32.0  ;;  %v936_v55 = vsel %vm932_vm15, %v2193_v49, 32.0 }
 0x3cf   : > { %v937_v56 = vsel %vm543_vm3, %v933_v52, inf  ;;  %v938_v57 = vsel %vm543_vm3, %v934_v53, inf  ;;  %v939_v58 = vsel %vm543_vm3, %v935_v54, inf  ;;  %v940_v59 = vsel %vm543_vm3, %v936_v55, inf  ;;  %v1765_v54 = vld [vmem:[%s2074_s18] sm:$0xff] }
 0x3d0   : > { %v941_v60 = vmin.f32 %v937_v56, %v938_v57  ;;  %v942_v61 = vmin.f32 %v939_v58, %v940_v59  ;;  %v927_v62 = vmul.f32 %v926_v51, %v924_v50  ;;  %v1472_v50 = vrot.slane %v1467_v41, %v1471_v42  ;;  %v1766_v56 = vld [vmem:[%s2074_s18 + $0x8] sm:$0xff]  ;;  %v1767_v58 = vld [vmem:[%s2074_s18 + $0x10] sm:$0xff]  ;;  %s1644_s18 = sld [smem:[#allocation7 + $0xf]] }
 0x3d1   : > { %v1476_v51 = vrot.slane %v1467_v41, %v1475_v43  ;;  %v1480_v52 = vrot.slane %v1467_v41, %v1479_v44 }
 0x3d2   : > { %v943_v63 = vmin.f32 %v941_v60, %v942_v61  ;;  %v928_v3 = vadd.f32 %v927_v62, %v882_v24  ;;  %v1484_v55 = vmul.f32 %v1765_v54, %v1472_v50 }
 0x3d3   : > { %v1485_v57 = vmul.f32 %v1766_v56, %v1476_v51  ;;  %v1486_v59 = vmul.f32 %v1767_v58, %v1480_v52 }
 0x3d4   : > { %v944_v4 = vrot.slane %v943_v63, 4 }
 0x3d5   : > { %v1487_v61 = vadd.f32 %v1485_v57, %v1484_v55  ;;  %v1488_v62 = vsel %vm285_vm0, %v1486_v59, 0.0  ;;  %v1064_v59 = vstv %s1640_s15 }
 0x3d6   : > { %v945_v5 = vmin.f32 %v943_v63, %v944_v4 }
 0x3d8   : > { %v946_v9 = vrot.slane %v945_v5, 2 }
 0x3da   : > { %v947_v10 = vmin.f32 %v945_v5, %v946_v9 }
 0x3dc   : > { %v948_v1 = vrot.slane %v947_v10, 1 }
 0x3de   : > { %v949_v11 = vmin.f32 %v947_v10, %v948_v1 }
 0x3e0   : > { %vm950_vm1 = vcmp.eq.f32.partialorder %v2187_v46, %v949_v11  ;;  %vm951_vm2 = vcmp.eq.f32.partialorder %v2189_v47, %v949_v11  ;;  %vm952_vm4 = vcmp.eq.f32.partialorder %v2191_v48, %v949_v11  ;;  %vm953_vm5 = vcmp.eq.f32.partialorder %v2193_v49, %v949_v11 }
 0x3e1   : > { %v954_v2 = vsel %vm950_vm1, -3e+38, %v908_v31  ;;  %v955_v15 = vsel %vm951_vm2, -3e+38, %v909_v28  ;;  %v956_v7 = vsel %vm952_vm4, -3e+38, %v910_v26 }
 0x3e2   : > { %v2335_v16 = vsel %vm953_vm5, -3e+38, %v911_v32  ;;  %v958_v0 = vsel %vm543_vm3, %v954_v2, -inf  ;;  %v959_v12 = vsel %vm543_vm3, %v955_v15, -inf  ;;  %v960_v13 = vsel %vm543_vm3, %v956_v7, -inf }
 0x3e3   : > { %v961_v14 = vsel %vm543_vm3, %v2335_v16, -inf  ;;  %v962_v17 = vmax.f32 %v958_v0, %v959_v12 }
 0x3e4   : > { %v963_v18 = vmax.f32 %v960_v13, %v961_v14 }
 0x3e6   : > { %v964_v20 = vmax.f32 %v962_v17, %v963_v18 }
 0x3e8   : > { %v965_v22 = vrot.slane %v964_v20, 4 }
 0x3ea   : > { %v966_v23 = vmax.f32 %v964_v20, %v965_v22  ;;  %v1018_v22 = vstv %s1639_s11 }
 0x3ec   : > { %v967_v8 = vrot.slane %v966_v23, 2 }
 0x3ee   : > { %v968_v21 = vmax.f32 %v966_v23, %v967_v8 }
 0x3f0   : > { %v969_v24 = vrot.slane %v968_v21, 1 }
 0x3f2   : > { %v970_v25 = vmax.f32 %v968_v21, %v969_v24 }
 0x3f4   : > { %vm975_vm6 = vcmp.eq.f32.partialorder %v954_v2, %v970_v25  ;;  %vm976_vm7 = vcmp.eq.f32.partialorder %v955_v15, %v970_v25  ;;  %vm977_vm8 = vcmp.eq.f32.partialorder %v956_v7, %v970_v25  ;;  %vm978_vm9 = vcmp.eq.f32.partialorder %v2335_v16, %v970_v25 }
 0x3f5   : > { %v979_v19 = vsel %vm975_vm6, %v2187_v46, 32.0  ;;  %v980_v27 = vsel %vm976_vm7, %v2189_v47, 32.0  ;;  %v981_v29 = vsel %vm977_vm8, %v2191_v48, 32.0  ;;  %v982_v30 = vsel %vm978_vm9, %v2193_v49, 32.0 }
 0x3f6   : > { %v983_v31 = vsel %vm543_vm3, %v979_v19, inf  ;;  %v984_v28 = vsel %vm543_vm3, %v980_v27, inf  ;;  %v985_v26 = vsel %vm543_vm3, %v981_v29, inf  ;;  %v986_v32 = vsel %vm543_vm3, %v982_v30, inf }
 0x3f7   : > { %v987_v33 = vmin.f32 %v983_v31, %v984_v28  ;;  %v988_v34 = vmin.f32 %v985_v26, %v986_v32  ;;  %v973_v35 = vmul.f32 %v972_v6, %v970_v25 }
 0x3f9   : > { %v989_v36 = vmin.f32 %v987_v33, %v988_v34  ;;  %v2351_v37 = vadd.f32 %v973_v35, %v928_v3  ;;  %v1489_v3 = vadd.f32 %v1488_v62, %v1487_v61 }
 0x3fb   : > { %v990_v39 = vrot.slane %v989_v36, 4  ;;  %1490 = vadd.xlane.f32.xlu0 %v1489_v3 }
 0x3fd   : > { %v991_v40 = vmin.f32 %v989_v36, %v990_v39 }
 0x3ff   : > { %v992_v45 = vrot.slane %v991_v40, 2 }
 0x401   : > { %v993_v53 = vmin.f32 %v991_v40, %v992_v45 }
 0x403   : > { %v994_v60 = vrot.slane %v993_v53, 1 }
 0x405   : > { %v995_v63 = vmin.f32 %v993_v53, %v994_v60 }
 0x407   : > { %vm996_vm10 = vcmp.eq.f32.partialorder %v2187_v46, %v995_v63  ;;  %vm997_vm11 = vcmp.eq.f32.partialorder %v2189_v47, %v995_v63  ;;  %vm998_vm12 = vcmp.eq.f32.partialorder %v2191_v48, %v995_v63  ;;  %vm999_vm13 = vcmp.eq.f32.partialorder %v2193_v49, %v995_v63 }
 0x408   : > { %v1000_v38 = vsel %vm996_vm10, -3e+38, %v954_v2  ;;  %v1001_v4 = vsel %vm997_vm11, -3e+38, %v955_v15  ;;  %v1002_v5 = vsel %vm998_vm12, -3e+38, %v956_v7 }
 0x409   : > { %v1003_v9 = vsel %vm999_vm13, -3e+38, %v2335_v16  ;;  %v1004_v10 = vsel %vm543_vm3, %v1000_v38, -inf  ;;  %v1005_v1 = vsel %vm543_vm3, %v1001_v4, -inf  ;;  %v1006_v11 = vsel %vm543_vm3, %v1002_v5, -inf }
 0x40a   : > { %v1007_v0 = vsel %vm543_vm3, %v1003_v9, -inf  ;;  %v1008_v12 = vmax.f32 %v1004_v10, %v1005_v1 }
 0x40b   : > { %v1009_v13 = vmax.f32 %v1006_v11, %v1007_v0 }
 0x40d   : > { %v1010_v14 = vmax.f32 %v1008_v12, %v1009_v13 }
 0x40f   : > { %v1011_v17 = vrot.slane %v1010_v14, 4 }
 0x411   : > { %v1012_v18 = vmax.f32 %v1010_v14, %v1011_v17 }
 0x413   : > { %v1013_v2 = vrot.slane %v1012_v18, 2 }
 0x415   : > { %v1014_v15 = vmax.f32 %v1012_v18, %v1013_v2 }
 0x417   : > { %v1015_v7 = vrot.slane %v1014_v15, 1 }
 0x419   : > { %v1016_v20 = vmax.f32 %v1014_v15, %v1015_v7 }
 0x41b   : > { %vm1021_vm0 = vcmp.eq.f32.partialorder %v1000_v38, %v1016_v20  ;;  %vm1022_vm14 = vcmp.eq.f32.partialorder %v1001_v4, %v1016_v20  ;;  %vm1023_vm15 = vcmp.eq.f32.partialorder %v1002_v5, %v1016_v20  ;;  %vm1024_vm1 = vcmp.eq.f32.partialorder %v1003_v9, %v1016_v20 }
 0x41c   : > { %v1025_v16 = vsel %vm1021_vm0, %v2187_v46, 32.0  ;;  %v1026_v23 = vsel %vm1022_vm14, %v2189_v47, 32.0  ;;  %v1027_v8 = vsel %vm1023_vm15, %v2191_v48, 32.0  ;;  %v1028_v21 = vsel %vm1024_vm1, %v2193_v49, 32.0 }
 0x41d   : > { %v1029_v24 = vsel %vm543_vm3, %v1025_v16, inf  ;;  %v1030_v25 = vsel %vm543_vm3, %v1026_v23, inf  ;;  %v1031_v6 = vsel %vm543_vm3, %v1027_v8, inf  ;;  %v1032_v19 = vsel %vm543_vm3, %v1028_v21, inf }
 0x41e   : > { %v1033_v27 = vmin.f32 %v1029_v24, %v1030_v25  ;;  %v1034_v29 = vmin.f32 %v1031_v6, %v1032_v19  ;;  %v1019_v30 = vmul.f32 %v1018_v22, %v1016_v20 }
 0x420   : > { %v1035_v31 = vmin.f32 %v1033_v27, %v1034_v29  ;;  %v1020_v28 = vadd.f32 %v1019_v30, %v2351_v37 }
 0x422   : > { %v1036_v26 = vrot.slane %v1035_v31, 4 }
 0x424   : > { %v1037_v32 = vmin.f32 %v1035_v31, %v1036_v26  ;;  %v1110_v26 = vstv %s1641_s26 }
 0x426   : > { %v1038_v33 = vrot.slane %v1037_v32, 2 }
 0x428   : > { %v1039_v34 = vmin.f32 %v1037_v32, %v1038_v33 }
 0x42a   : > { %v1040_v35 = vrot.slane %v1039_v34, 1 }
 0x42c   : > { %v1041_v36 = vmin.f32 %v1039_v34, %v1040_v35 }
 0x42e   : > { %vm1042_vm2 = vcmp.eq.f32.partialorder %v2187_v46, %v1041_v36  ;;  %vm1043_vm4 = vcmp.eq.f32.partialorder %v2189_v47, %v1041_v36  ;;  %vm1044_vm5 = vcmp.eq.f32.partialorder %v2191_v48, %v1041_v36  ;;  %vm1045_vm6 = vcmp.eq.f32.partialorder %v2193_v49, %v1041_v36 }
 0x42f   : > { %v1046_v39 = vsel %vm1042_vm2, -3e+38, %v1000_v38  ;;  %v1047_v40 = vsel %vm1043_vm4, -3e+38, %v1001_v4  ;;  %v1048_v41 = vsel %vm1044_vm5, -3e+38, %v1002_v5 }
 0x430   : > { %v1049_v42 = vsel %vm1045_vm6, -3e+38, %v1003_v9  ;;  %v1050_v37 = vsel %vm543_vm3, %v1046_v39, -inf  ;;  %v1051_v43 = vsel %vm543_vm3, %v1047_v40, -inf  ;;  %v1052_v44 = vsel %vm543_vm3, %v1048_v41, -inf }
 0x431   : > { %v1053_v45 = vsel %vm543_vm3, %v1049_v42, -inf  ;;  %v1054_v50 = vmax.f32 %v1050_v37, %v1051_v43 }
 0x432   : > { %v1055_v51 = vmax.f32 %v1052_v44, %v1053_v45 }
 0x434   : > { %v1056_v52 = vmax.f32 %v1054_v50, %v1055_v51 }
 0x436   : > { %v1057_v53 = vrot.slane %v1056_v52, 4 }
 0x438   : > { %v1058_v54 = vmax.f32 %v1056_v52, %v1057_v53 }
 0x43a   : > { %v1059_v55 = vrot.slane %v1058_v54, 2 }
 0x43c   : > { %v1060_v56 = vmax.f32 %v1058_v54, %v1059_v55 }
 0x43e   : > { %v1061_v57 = vrot.slane %v1060_v56, 1 }
 0x440   : > { %v1062_v58 = vmax.f32 %v1060_v56, %v1061_v57 }
 0x442   : > { %vm1067_vm7 = vcmp.eq.f32.partialorder %v1046_v39, %v1062_v58  ;;  %vm1068_vm8 = vcmp.eq.f32.partialorder %v1047_v40, %v1062_v58  ;;  %vm1069_vm9 = vcmp.eq.f32.partialorder %v1048_v41, %v1062_v58  ;;  %vm1070_vm10 = vcmp.eq.f32.partialorder %v1049_v42, %v1062_v58 }
 0x443   : > { %v1071_v60 = vsel %vm1067_vm7, %v2187_v46, 32.0  ;;  %v1072_v61 = vsel %vm1068_vm8, %v2189_v47, 32.0  ;;  %v1073_v62 = vsel %vm1069_vm9, %v2191_v48, 32.0  ;;  %v1074_v63 = vsel %vm1070_vm10, %v2193_v49, 32.0 }
 0x444   : > { %v1075_v3 = vsel %vm543_vm3, %v1071_v60, inf  ;;  %v1076_v38 = vsel %vm543_vm3, %v1072_v61, inf  ;;  %v1077_v4 = vsel %vm543_vm3, %v1073_v62, inf  ;;  %v1078_v5 = vsel %vm543_vm3, %v1074_v63, inf }
 0x445   : > { %v1079_v9 = vmin.f32 %v1075_v3, %v1076_v38  ;;  %v1080_v10 = vmin.f32 %v1077_v4, %v1078_v5  ;;  %v1065_v1 = vmul.f32 %v1064_v59, %v1062_v58 }
 0x447   : > { %v1081_v11 = vmin.f32 %v1079_v9, %v1080_v10  ;;  %v1066_v0 = vadd.f32 %v1065_v1, %v1020_v28 }
 0x449   : > { %v1082_v12 = vrot.slane %v1081_v11, 4 }
 0x44b   : > { %v1083_v13 = vmin.f32 %v1081_v11, %v1082_v12 }
 0x44d   : > { %v1084_v14 = vrot.slane %v1083_v13, 2 }
 0x44f   : > { %v1085_v17 = vmin.f32 %v1083_v13, %v1084_v14 }
 0x451   : > { %v1086_v18 = vrot.slane %v1085_v17, 1 }
 0x453   : > { %v1087_v2 = vmin.f32 %v1085_v17, %v1086_v18 }
 0x455   : > { %vm1088_vm11 = vcmp.eq.f32.partialorder %v2187_v46, %v1087_v2  ;;  %vm1089_vm12 = vcmp.eq.f32.partialorder %v2189_v47, %v1087_v2  ;;  %vm1090_vm13 = vcmp.eq.f32.partialorder %v2191_v48, %v1087_v2  ;;  %vm1091_vm0 = vcmp.eq.f32.partialorder %v2193_v49, %v1087_v2 }
 0x456   : > { %v1092_v15 = vsel %vm1088_vm11, -3e+38, %v1046_v39  ;;  %v1093_v7 = vsel %vm1089_vm12, -3e+38, %v1047_v40  ;;  %v1094_v20 = vsel %vm1090_vm13, -3e+38, %v1048_v41 }
 0x457   : > { %v1095_v22 = vsel %vm1091_vm0, -3e+38, %v1049_v42  ;;  %v1096_v16 = vsel %vm543_vm3, %v1092_v15, -inf  ;;  %v1097_v23 = vsel %vm543_vm3, %v1093_v7, -inf  ;;  %v1098_v8 = vsel %vm543_vm3, %v1094_v20, -inf }
 0x458   : > { %v1099_v21 = vsel %vm543_vm3, %v1095_v22, -inf  ;;  %v1100_v24 = vmax.f32 %v1096_v16, %v1097_v23 }
 0x459   : > { %v1101_v25 = vmax.f32 %v1098_v8, %v1099_v21 }
 0x45b   : > { %v1102_v6 = vmax.f32 %v1100_v24, %v1101_v25 }
 0x45d   : > { %v1103_v19 = vrot.slane %v1102_v6, 4 }
 0x45f   : > { %v1104_v27 = vmax.f32 %v1102_v6, %v1103_v19 }
 0x461   : > { %v1105_v29 = vrot.slane %v1104_v27, 2 }
 0x463   : > { %v1106_v30 = vmax.f32 %v1104_v27, %v1105_v29 }
 0x465   : > { %v1107_v31 = vrot.slane %v1106_v30, 1 }
 0x467   : > { %v1108_v28 = vmax.f32 %v1106_v30, %v1107_v31 }
 0x469   : > { %vm1113_vm14 = vcmp.eq.f32.partialorder %v1092_v15, %v1108_v28  ;;  %vm1114_vm15 = vcmp.eq.f32.partialorder %v1093_v7, %v1108_v28  ;;  %vm1115_vm1 = vcmp.eq.f32.partialorder %v1094_v20, %v1108_v28  ;;  %vm1116_vm2 = vcmp.eq.f32.partialorder %v1095_v22, %v1108_v28 }
 0x46a   : > { %v1117_v32 = vsel %vm1113_vm14, %v2187_v46, 32.0  ;;  %v1118_v33 = vsel %vm1114_vm15, %v2189_v47, 32.0  ;;  %v1119_v34 = vsel %vm1115_vm1, %v2191_v48, 32.0  ;;  %v1120_v35 = vsel %vm1116_vm2, %v2193_v49, 32.0 }
 0x46b   : > { %v1121_v36 = vsel %vm543_vm3, %v1117_v32, inf  ;;  %v1122_v39 = vsel %vm543_vm3, %v1118_v33, inf  ;;  %v1123_v40 = vsel %vm543_vm3, %v1119_v34, inf  ;;  %v1124_v41 = vsel %vm543_vm3, %v1120_v35, inf }
 0x46c   : > { %v1125_v42 = vmin.f32 %v1121_v36, %v1122_v39  ;;  %v1126_v37 = vmin.f32 %v1123_v40, %v1124_v41  ;;  %v1111_v43 = vmul.f32 %v1110_v26, %v1108_v28 }
 0x46e   : > { %v1127_v44 = vmin.f32 %v1125_v42, %v1126_v37  ;;  %v1112_v45 = vadd.f32 %v1111_v43, %v1066_v0  ;;  %v1156_v0 = vstv %s1642_s27 }
 0x470   : > { %v1128_v50 = vrot.slane %v1127_v44, 4 }
 0x472   : > { %v1129_v51 = vmin.f32 %v1127_v44, %v1128_v50 }
 0x474   : > { %v1130_v52 = vrot.slane %v1129_v51, 2 }
 0x476   : > { %v1131_v53 = vmin.f32 %v1129_v51, %v1130_v52 }
 0x478   : > { %v1132_v54 = vrot.slane %v1131_v53, 1 }
 0x47a   : > { %v1133_v55 = vmin.f32 %v1131_v53, %v1132_v54 }
 0x47c   : > { %vm1137_vm4 = vcmp.eq.f32.partialorder %v2193_v49, %v1133_v55  ;;  %vm1134_vm5 = vcmp.eq.f32.partialorder %v2187_v46, %v1133_v55  ;;  %vm1135_vm6 = vcmp.eq.f32.partialorder %v2189_v47, %v1133_v55  ;;  %vm1136_vm7 = vcmp.eq.f32.partialorder %v2191_v48, %v1133_v55 }
 0x47d   : > { %v1141_v56 = vsel %vm1137_vm4, -3e+38, %v1095_v22  ;;  %v1138_v57 = vsel %vm1134_vm5, -3e+38, %v1092_v15  ;;  %v1139_v58 = vsel %vm1135_vm6, -3e+38, %v1093_v7 }
 0x47e   : > { %v1145_v59 = vsel %vm543_vm3, %v1141_v56, -inf  ;;  %v1140_v60 = vsel %vm1136_vm7, -3e+38, %v1094_v20  ;;  %v1142_v61 = vsel %vm543_vm3, %v1138_v57, -inf  ;;  %v1143_v62 = vsel %vm543_vm3, %v1139_v58, -inf }
 0x47f   : > { %v1144_v63 = vsel %vm543_vm3, %v1140_v60, -inf  ;;  %v1146_v3 = vmax.f32 %v1142_v61, %v1143_v62 }
 0x480   : > { %v1147_v38 = vmax.f32 %v1144_v63, %v1145_v59 }
 0x482   : > { %v1148_v4 = vmax.f32 %v1146_v3, %v1147_v38 }
 0x484   : > { %v1149_v5 = vrot.slane %v1148_v4, 4 }
 0x486   : > { %v1150_v9 = vmax.f32 %v1148_v4, %v1149_v5 }
 0x488   : > { %v1151_v10 = vrot.slane %v1150_v9, 2 }
 0x48a   : > { %v1152_v1 = vmax.f32 %v1150_v9, %v1151_v10 }
 0x48c   : > { %v1153_v11 = vrot.slane %v1152_v1, 1 }
 0x48e   : > { %v1154_v12 = vmax.f32 %v1152_v1, %v1153_v11 }
 0x490   : > { %v1157_v13 = vmul.f32 %v1156_v0, %v1154_v12  ;;  %vm1159_vm8 = vcmp.eq.f32.partialorder %v1138_v57, %v1154_v12  ;;  %vm1160_vm9 = vcmp.eq.f32.partialorder %v1139_v58, %v1154_v12  ;;  %vm1161_vm10 = vcmp.eq.f32.partialorder %v1140_v60, %v1154_v12 }
 0x491   : > { %vm1162_vm11 = vcmp.eq.f32.partialorder %v1141_v56, %v1154_v12  ;;  %v1163_v14 = vsel %vm1159_vm8, %v2187_v46, 32.0  ;;  %v1164_v17 = vsel %vm1160_vm9, %v2189_v47, 32.0  ;;  %v1165_v18 = vsel %vm1161_vm10, %v2191_v48, 32.0 }
 0x492   : > { %v1158_v2 = vadd.f32 %v1157_v13, %v1112_v45  ;;  %v1166_v15 = vsel %vm1162_vm11, %v2193_v49, 32.0  ;;  %v1167_v7 = vsel %vm543_vm3, %v1163_v14, inf  ;;  %v1168_v20 = vsel %vm543_vm3, %v1164_v17, inf }
 0x493   : > { %v1169_v22 = vsel %vm543_vm3, %v1165_v18, inf  ;;  %v1170_v16 = vsel %vm543_vm3, %v1166_v15, inf  ;;  %v1171_v23 = vmin.f32 %v1167_v7, %v1168_v20  ;;  %v1202_v45 = vstv %s1643_s30 }
 0x494   : > { %v1172_v8 = vmin.f32 %v1169_v22, %v1170_v16 }
 0x496   : > { %v1173_v21 = vmin.f32 %v1171_v23, %v1172_v8 }
 0x498   : > { %v1174_v24 = vrot.slane %v1173_v21, 4 }
 0x49a   : > { %v1175_v25 = vmin.f32 %v1173_v21, %v1174_v24  ;;  %v1248_v21 = vstv %s1644_s18 }
 0x49c   : > { %v1176_v6 = vrot.slane %v1175_v25, 2 }
 0x49e   : > { %v1177_v19 = vmin.f32 %v1175_v25, %v1176_v6 }
 0x4a0   : > { %v1178_v27 = vrot.slane %v1177_v19, 1 }
 0x4a2   : > { %v1179_v29 = vmin.f32 %v1177_v19, %v1178_v27 }
 0x4a4   : > { %vm1180_vm12 = vcmp.eq.f32.partialorder %v2187_v46, %v1179_v29  ;;  %vm1181_vm13 = vcmp.eq.f32.partialorder %v2189_v47, %v1179_v29  ;;  %vm1182_vm0 = vcmp.eq.f32.partialorder %v2191_v48, %v1179_v29  ;;  %vm1183_vm14 = vcmp.eq.f32.partialorder %v2193_v49, %v1179_v29 }
 0x4a5   : > { %v1184_v30 = vsel %vm1180_vm12, -3e+38, %v1138_v57  ;;  %v1185_v31 = vsel %vm1181_vm13, -3e+38, %v1139_v58  ;;  %v1186_v28 = vsel %vm1182_vm0, -3e+38, %v1140_v60 }
 0x4a6   : > { %v1187_v26 = vsel %vm1183_vm14, -3e+38, %v1141_v56  ;;  %v1188_v32 = vsel %vm543_vm3, %v1184_v30, -inf  ;;  %v1189_v33 = vsel %vm543_vm3, %v1185_v31, -inf  ;;  %v1190_v34 = vsel %vm543_vm3, %v1186_v28, -inf }
 0x4a7   : > { %v1191_v35 = vsel %vm543_vm3, %v1187_v26, -inf  ;;  %v1192_v36 = vmax.f32 %v1188_v32, %v1189_v33 }
 0x4a8   : > { %v1193_v39 = vmax.f32 %v1190_v34, %v1191_v35 }
 0x4aa   : > { %v1194_v40 = vmax.f32 %v1192_v36, %v1193_v39 }
 0x4ac   : > { %v1195_v41 = vrot.slane %v1194_v40, 4 }
 0x4ae   : > { %v1196_v42 = vmax.f32 %v1194_v40, %v1195_v41 }
 0x4b0   : > { %v1197_v37 = vrot.slane %v1196_v42, 2 }
 0x4b2   : > { %v1198_v43 = vmax.f32 %v1196_v42, %v1197_v37 }
 0x4b4   : > { %v1199_v44 = vrot.slane %v1198_v43, 1 }
 0x4b6   : > { %v1200_v50 = vmax.f32 %v1198_v43, %v1199_v44 }
 0x4b8   : > { %v1203_v51 = vmul.f32 %v1202_v45, %v1200_v50  ;;  %vm1205_vm15 = vcmp.eq.f32.partialorder %v1184_v30, %v1200_v50  ;;  %vm1206_vm1 = vcmp.eq.f32.partialorder %v1185_v31, %v1200_v50  ;;  %vm1207_vm2 = vcmp.eq.f32.partialorder %v1186_v28, %v1200_v50 }
 0x4b9   : > { %vm1208_vm4 = vcmp.eq.f32.partialorder %v1187_v26, %v1200_v50  ;;  %v1209_v52 = vsel %vm1205_vm15, %v2187_v46, 32.0  ;;  %v1210_v53 = vsel %vm1206_vm1, %v2189_v47, 32.0  ;;  %v1211_v54 = vsel %vm1207_vm2, %v2191_v48, 32.0 }
 0x4ba   : > { %v1204_v55 = vadd.f32 %v1203_v51, %v1158_v2  ;;  %v1212_v56 = vsel %vm1208_vm4, %v2193_v49, 32.0  ;;  %v1213_v57 = vsel %vm543_vm3, %v1209_v52, inf  ;;  %v1214_v58 = vsel %vm543_vm3, %v1210_v53, inf }
 0x4bb   : > { %v1215_v59 = vsel %vm543_vm3, %v1211_v54, inf  ;;  %v1216_v60 = vsel %vm543_vm3, %v1212_v56, inf  ;;  %v1217_v61 = vmin.f32 %v1213_v57, %v1214_v58 }
 0x4bc   : > { %v1218_v62 = vmin.f32 %v1215_v59, %v1216_v60 }
 0x4be   : > { %v1219_v63 = vmin.f32 %v1217_v61, %v1218_v62 }
 0x4c0   : > { %v1220_v3 = vrot.slane %v1219_v63, 4 }
 0x4c2   : > { %v1221_v38 = vmin.f32 %v1219_v63, %v1220_v3  ;;  %v1294_v63 = vstv %s1645_s12 }
 0x4c4   : > { %v1222_v4 = vrot.slane %v1221_v38, 2 }
 0x4c6   : > { %v1223_v5 = vmin.f32 %v1221_v38, %v1222_v4 }
 0x4c8   : > { %v1224_v9 = vrot.slane %v1223_v5, 1 }
 0x4ca   : > { %v1225_v10 = vmin.f32 %v1223_v5, %v1224_v9 }
 0x4cc   : > { %vm1226_vm5 = vcmp.eq.f32.partialorder %v2187_v46, %v1225_v10  ;;  %vm1227_vm6 = vcmp.eq.f32.partialorder %v2189_v47, %v1225_v10  ;;  %vm1228_vm7 = vcmp.eq.f32.partialorder %v2191_v48, %v1225_v10  ;;  %vm1229_vm8 = vcmp.eq.f32.partialorder %v2193_v49, %v1225_v10 }
 0x4cd   : > { %v1230_v1 = vsel %vm1226_vm5, -3e+38, %v1184_v30  ;;  %v1231_v11 = vsel %vm1227_vm6, -3e+38, %v1185_v31  ;;  %v1232_v0 = vsel %vm1228_vm7, -3e+38, %v1186_v28 }
 0x4ce   : > { %v1233_v12 = vsel %vm1229_vm8, -3e+38, %v1187_v26  ;;  %v1234_v13 = vsel %vm543_vm3, %v1230_v1, -inf  ;;  %v1235_v14 = vsel %vm543_vm3, %v1231_v11, -inf  ;;  %v1236_v17 = vsel %vm543_vm3, %v1232_v0, -inf }
 0x4cf   : > { %v1237_v18 = vsel %vm543_vm3, %v1233_v12, -inf  ;;  %v1238_v2 = vmax.f32 %v1234_v13, %v1235_v14 }
 0x4d0   : > { %v1239_v15 = vmax.f32 %v1236_v17, %v1237_v18 }
 0x4d2   : > { %v1240_v7 = vmax.f32 %v1238_v2, %v1239_v15 }
 0x4d4   : > { %v1241_v20 = vrot.slane %v1240_v7, 4 }
 0x4d6   : > { %v1242_v22 = vmax.f32 %v1240_v7, %v1241_v20 }
 0x4d8   : > { %v1243_v16 = vrot.slane %v1242_v22, 2 }
 0x4da   : > { %v1244_v23 = vmax.f32 %v1242_v22, %v1243_v16 }
 0x4dc   : > { %v1245_v8 = vrot.slane %v1244_v23, 1 }
 0x4de   : > { %v1246_v24 = vmax.f32 %v1244_v23, %v1245_v8 }
 0x4e0   : > { %v1249_v25 = vmul.f32 %v1248_v21, %v1246_v24  ;;  %vm1251_vm9 = vcmp.eq.f32.partialorder %v1230_v1, %v1246_v24  ;;  %vm1252_vm10 = vcmp.eq.f32.partialorder %v1231_v11, %v1246_v24  ;;  %vm1253_vm11 = vcmp.eq.f32.partialorder %v1232_v0, %v1246_v24 }
 0x4e1   : > { %vm1254_vm12 = vcmp.eq.f32.partialorder %v1233_v12, %v1246_v24  ;;  %v1255_v6 = vsel %vm1251_vm9, %v2187_v46, 32.0  ;;  %v1256_v19 = vsel %vm1252_vm10, %v2189_v47, 32.0  ;;  %v1257_v27 = vsel %vm1253_vm11, %v2191_v48, 32.0 }
 0x4e2   : > { %v1250_v29 = vadd.f32 %v1249_v25, %v1204_v55  ;;  %v1258_v30 = vsel %vm1254_vm12, %v2193_v49, 32.0  ;;  %v1259_v31 = vsel %vm543_vm3, %v1255_v6, inf  ;;  %v1260_v28 = vsel %vm543_vm3, %v1256_v19, inf }
 0x4e3   : > { %v1261_v26 = vsel %vm543_vm3, %v1257_v27, inf  ;;  %v1262_v32 = vsel %vm543_vm3, %v1258_v30, inf  ;;  %v1263_v33 = vmin.f32 %v1259_v31, %v1260_v28 }
 0x4e4   : > { %v1264_v34 = vmin.f32 %v1261_v26, %v1262_v32 }
 0x4e6   : > { %v1265_v35 = vmin.f32 %v1263_v33, %v1264_v34 }
 0x4e8   : > { %v1266_v36 = vrot.slane %v1265_v35, 4 }
 0x4ea   : > { %v1267_v39 = vmin.f32 %v1265_v35, %v1266_v36  ;;  %v1340_v35 = vstv %s1646_s13 }
 0x4ec   : > { %v1268_v40 = vrot.slane %v1267_v39, 2 }
 0x4ee   : > { %v1269_v41 = vmin.f32 %v1267_v39, %v1268_v40 }
 0x4f0   : > { %v1270_v42 = vrot.slane %v1269_v41, 1 }
 0x4f2   : > { %v1271_v37 = vmin.f32 %v1269_v41, %v1270_v42 }
 0x4f4   : > { %vm1272_vm13 = vcmp.eq.f32.partialorder %v2187_v46, %v1271_v37  ;;  %vm1273_vm0 = vcmp.eq.f32.partialorder %v2189_v47, %v1271_v37  ;;  %vm1274_vm14 = vcmp.eq.f32.partialorder %v2191_v48, %v1271_v37  ;;  %vm1275_vm15 = vcmp.eq.f32.partialorder %v2193_v49, %v1271_v37 }
 0x4f5   : > { %v1276_v43 = vsel %vm1272_vm13, -3e+38, %v1230_v1  ;;  %v1277_v44 = vsel %vm1273_vm0, -3e+38, %v1231_v11  ;;  %v1278_v45 = vsel %vm1274_vm14, -3e+38, %v1232_v0 }
 0x4f6   : > { %v1279_v50 = vsel %vm1275_vm15, -3e+38, %v1233_v12  ;;  %v1280_v51 = vsel %vm543_vm3, %v1276_v43, -inf  ;;  %v1281_v52 = vsel %vm543_vm3, %v1277_v44, -inf  ;;  %v1282_v53 = vsel %vm543_vm3, %v1278_v45, -inf }
 0x4f7   : > { %v1283_v54 = vsel %vm543_vm3, %v1279_v50, -inf  ;;  %v1284_v55 = vmax.f32 %v1280_v51, %v1281_v52 }
 0x4f8   : > { %v1285_v56 = vmax.f32 %v1282_v53, %v1283_v54 }
 0x4fa   : > { %v1286_v57 = vmax.f32 %v1284_v55, %v1285_v56 }
 0x4fc   : > { %v1287_v58 = vrot.slane %v1286_v57, 4 }
 0x4fe   : > { %v1288_v59 = vmax.f32 %v1286_v57, %v1287_v58 }
 0x500   : > { %v1289_v60 = vrot.slane %v1288_v59, 2 }
 0x502   : > { %v1290_v61 = vmax.f32 %v1288_v59, %v1289_v60 }
 0x504   : > { %v1291_v62 = vrot.slane %v1290_v61, 1 }
 0x506   : > { %v1292_v3 = vmax.f32 %v1290_v61, %v1291_v62 }
 0x508   : > { %v1295_v38 = vmul.f32 %v1294_v63, %v1292_v3  ;;  %vm1297_vm1 = vcmp.eq.f32.partialorder %v1276_v43, %v1292_v3  ;;  %vm1298_vm2 = vcmp.eq.f32.partialorder %v1277_v44, %v1292_v3  ;;  %vm1299_vm4 = vcmp.eq.f32.partialorder %v1278_v45, %v1292_v3 }
 0x509   : > { %vm1300_vm5 = vcmp.eq.f32.partialorder %v1279_v50, %v1292_v3  ;;  %v1301_v4 = vsel %vm1297_vm1, %v2187_v46, 32.0  ;;  %v1302_v5 = vsel %vm1298_vm2, %v2189_v47, 32.0  ;;  %v1303_v9 = vsel %vm1299_vm4, %v2191_v48, 32.0 }
 0x50a   : > { %v1296_v10 = vadd.f32 %v1295_v38, %v1250_v29  ;;  %v1304_v1 = vsel %vm1300_vm5, %v2193_v49, 32.0  ;;  %v1305_v11 = vsel %vm543_vm3, %v1301_v4, inf  ;;  %v1306_v0 = vsel %vm543_vm3, %v1302_v5, inf }
 0x50b   : > { %v1307_v12 = vsel %vm543_vm3, %v1303_v9, inf  ;;  %v1308_v13 = vsel %vm543_vm3, %v1304_v1, inf  ;;  %v1309_v14 = vmin.f32 %v1305_v11, %v1306_v0 }
 0x50c   : > { %v1310_v17 = vmin.f32 %v1307_v12, %v1308_v13 }
 0x50e   : > { %v1311_v18 = vmin.f32 %v1309_v14, %v1310_v17 }
 0x510   : > { %v1312_v2 = vrot.slane %v1311_v18, 4 }
 0x512   : > { %v1313_v15 = vmin.f32 %v1311_v18, %v1312_v2 }
 0x514   : > { %v1314_v7 = vrot.slane %v1313_v15, 2 }
 0x516   : > { %v1315_v20 = vmin.f32 %v1313_v15, %v1314_v7 }
 0x518   : > { %v1316_v22 = vrot.slane %v1315_v20, 1 }
 0x51a   : > { %v1317_v16 = vmin.f32 %v1315_v20, %v1316_v22 }
 0x51c   : > { %vm1318_vm6 = vcmp.eq.f32.partialorder %v2187_v46, %v1317_v16  ;;  %vm1319_vm7 = vcmp.eq.f32.partialorder %v2189_v47, %v1317_v16  ;;  %vm1320_vm8 = vcmp.eq.f32.partialorder %v2191_v48, %v1317_v16  ;;  %vm1321_vm9 = vcmp.eq.f32.partialorder %v2193_v49, %v1317_v16 }
 0x51d   : > { %v1322_v23 = vsel %vm1318_vm6, -3e+38, %v1276_v43  ;;  %v1323_v8 = vsel %vm1319_vm7, -3e+38, %v1277_v44  ;;  %v1324_v21 = vsel %vm1320_vm8, -3e+38, %v1278_v45 }
 0x51e   : > { %v1325_v24 = vsel %vm1321_vm9, -3e+38, %v1279_v50  ;;  %v1326_v25 = vsel %vm543_vm3, %v1322_v23, -inf  ;;  %v1327_v6 = vsel %vm543_vm3, %v1323_v8, -inf  ;;  %v1328_v19 = vsel %vm543_vm3, %v1324_v21, -inf }
 0x51f   : > { %v1329_v27 = vsel %vm543_vm3, %v1325_v24, -inf  ;;  %v1330_v29 = vmax.f32 %v1326_v25, %v1327_v6 }
 0x520   : > { %v1331_v30 = vmax.f32 %v1328_v19, %v1329_v27 }
 0x522   : > { %v1332_v31 = vmax.f32 %v1330_v29, %v1331_v30 }
 0x524   : > { %v1333_v28 = vrot.slane %v1332_v31, 4 }
 0x526   : > { %v1334_v26 = vmax.f32 %v1332_v31, %v1333_v28 }
 0x528   : > { %v1335_v32 = vrot.slane %v1334_v26, 2 }
 0x52a   : > { %v1336_v33 = vmax.f32 %v1334_v26, %v1335_v32 }
 0x52c   : > { %v1337_v34 = vrot.slane %v1336_v33, 1 }
 0x52e   : > { %v1338_v36 = vmax.f32 %v1336_v33, %v1337_v34 }
 0x530   : > { %v1341_v39 = vmul.f32 %v1340_v35, %v1338_v36  ;;  %vm1343_vm10 = vcmp.eq.f32.partialorder %v1322_v23, %v1338_v36  ;;  %vm1344_vm11 = vcmp.eq.f32.partialorder %v1323_v8, %v1338_v36  ;;  %vm1345_vm12 = vcmp.eq.f32.partialorder %v1324_v21, %v1338_v36 }
 0x531   : > { %vm1346_vm13 = vcmp.eq.f32.partialorder %v1325_v24, %v1338_v36  ;;  %v1347_v40 = vsel %vm1343_vm10, %v2187_v46, 32.0  ;;  %v1348_v41 = vsel %vm1344_vm11, %v2189_v47, 32.0  ;;  %v1349_v42 = vsel %vm1345_vm12, %v2191_v48, 32.0 }
 0x532   : > { %v2488_v37 = vadd.f32 %v1341_v39, %v1296_v10  ;;  %v1350_v43 = vsel %vm1346_vm13, %v2193_v49, 32.0  ;;  %v1351_v44 = vsel %vm543_vm3, %v1347_v40, inf  ;;  %v1352_v45 = vsel %vm543_vm3, %v1348_v41, inf }
 0x533   : > { %v1353_v50 = vsel %vm543_vm3, %v1349_v42, inf  ;;  %v1354_v51 = vsel %vm543_vm3, %v1350_v43, inf  ;;  %v1355_v52 = vmin.f32 %v1351_v44, %v1352_v45  ;;  %v1386_v42 = vstv %s1647_s7 }
 0x534   : > { %v1356_v53 = vmin.f32 %v1353_v50, %v1354_v51  ;;  %v1432_v50 = vstv %s1648_s20  ;;  %vm1521_vm11 = vcmask 0  }
 0x536   : > { %v1357_v54 = vmin.f32 %v1355_v52, %v1356_v53 }
 0x538   : > { %v1358_v55 = vrot.slane %v1357_v54, 4 }
 0x53a   : > { %v1359_v56 = vmin.f32 %v1357_v54, %v1358_v55  ;;  %v1491_v55 = vpop.xlane.xlu0 %1490 }
 0x53c   : > { %v1360_v57 = vrot.slane %v1359_v56, 2 }
 0x53e   : > { %v1361_v58 = vmin.f32 %v1359_v56, %v1360_v57  ;;  %v1492_v56 = vrot.slane %v1491_v55, 4 }
 0x540   : > { %v1362_v59 = vrot.slane %v1361_v58, 1  ;;  %v1493_v57 = vmax.f32 %v1491_v55, %v1492_v56 }
 0x542   : > { %v1363_v60 = vmin.f32 %v1361_v58, %v1362_v59  ;;  %v1494_v58 = vrot.slane %v1493_v57, 2 }
 0x544   : > { %vm1364_vm0 = vcmp.eq.f32.partialorder %v2187_v46, %v1363_v60  ;;  %vm1365_vm14 = vcmp.eq.f32.partialorder %v2189_v47, %v1363_v60  ;;  %vm1366_vm15 = vcmp.eq.f32.partialorder %v2191_v48, %v1363_v60  ;;  %vm1367_vm1 = vcmp.eq.f32.partialorder %v2193_v49, %v1363_v60 }
 0x545   : > { %v1368_v61 = vsel %vm1364_vm0, -3e+38, %v1322_v23  ;;  %v1369_v62 = vsel %vm1365_vm14, -3e+38, %v1323_v8  ;;  %v1370_v63 = vsel %vm1366_vm15, -3e+38, %v1324_v21  ;;  %v1495_v59 = vmax.f32 %v1493_v57, %v1494_v58 }
 0x546   : > { %v1371_v3 = vsel %vm1367_vm1, -3e+38, %v1325_v24  ;;  %v1372_v38 = vsel %vm543_vm3, %v1368_v61, -inf  ;;  %v1373_v4 = vsel %vm543_vm3, %v1369_v62, -inf  ;;  %v1374_v5 = vsel %vm543_vm3, %v1370_v63, -inf }
 0x547   : > { %v1375_v9 = vsel %vm543_vm3, %v1371_v3, -inf  ;;  %v1376_v10 = vmax.f32 %v1372_v38, %v1373_v4  ;;  %v1496_v60 = vrot.slane %v1495_v59, 1 }
 0x548   : > { %v1377_v1 = vmax.f32 %v1374_v5, %v1375_v9 }
 0x54a   : > { %v1378_v11 = vmax.f32 %v1376_v10, %v1377_v1 }
 0x54c   : > { %v1379_v0 = vrot.slane %v1378_v11, 4 }
 0x54e   : > { %v1380_v12 = vmax.f32 %v1378_v11, %v1379_v0 }
 0x550   : > { %v1381_v13 = vrot.slane %v1380_v12, 2 }
 0x552   : > { %v1382_v14 = vmax.f32 %v1380_v12, %v1381_v13 }
 0x554   : > { %v1383_v17 = vrot.slane %v1382_v14, 1 }
 0x556   : > { %v1384_v18 = vmax.f32 %v1382_v14, %v1383_v17 }
 0x558   : > { %vm1389_vm2 = vcmp.eq.f32.partialorder %v1368_v61, %v1384_v18  ;;  %vm1390_vm4 = vcmp.eq.f32.partialorder %v1369_v62, %v1384_v18  ;;  %vm1391_vm5 = vcmp.eq.f32.partialorder %v1370_v63, %v1384_v18  ;;  %vm1392_vm6 = vcmp.eq.f32.partialorder %v1371_v3, %v1384_v18 }
 0x559   : > { %v1393_v2 = vsel %vm1389_vm2, %v2187_v46, 32.0  ;;  %v1394_v15 = vsel %vm1390_vm4, %v2189_v47, 32.0  ;;  %v1395_v7 = vsel %vm1391_vm5, %v2191_v48, 32.0  ;;  %v1396_v20 = vsel %vm1392_vm6, %v2193_v49, 32.0 }
 0x55a   : > { %v1397_v22 = vsel %vm543_vm3, %v1393_v2, inf  ;;  %v1398_v16 = vsel %vm543_vm3, %v1394_v15, inf  ;;  %v1399_v23 = vsel %vm543_vm3, %v1395_v7, inf  ;;  %v1400_v8 = vsel %vm543_vm3, %v1396_v20, inf }
 0x55b   : > { %v1401_v21 = vmin.f32 %v1397_v22, %v1398_v16  ;;  %v1402_v24 = vmin.f32 %v1399_v23, %v1400_v8  ;;  %v1387_v44 = vmul.f32 %v1386_v42, %v1384_v18  ;;  %v1519_v7 = vstv %s1649_s24 }
 0x55d   : > { %v1403_v25 = vmin.f32 %v1401_v21, %v1402_v24  ;;  %v1388_v52 = vadd.f32 %v1387_v44, %v2488_v37 }
 0x55f   : > { %v1404_v6 = vrot.slane %v1403_v25, 4 }
 0x561   : > { %v1405_v19 = vmin.f32 %v1403_v25, %v1404_v6 }
 0x563   : > { %v1406_v27 = vrot.slane %v1405_v19, 2 }
 0x565   : > { %v1407_v29 = vmin.f32 %v1405_v19, %v1406_v27 }
 0x567   : > { %v1408_v30 = vrot.slane %v1407_v29, 1 }
 0x569   : > { %v1409_v31 = vmin.f32 %v1407_v29, %v1408_v30 }
 0x56b   : > { %vm1410_vm7 = vcmp.eq.f32.partialorder %v2187_v46, %v1409_v31  ;;  %vm1411_vm8 = vcmp.eq.f32.partialorder %v2189_v47, %v1409_v31  ;;  %vm1412_vm9 = vcmp.eq.f32.partialorder %v2191_v48, %v1409_v31  ;;  %vm1413_vm10 = vcmp.eq.f32.partialorder %v2193_v49, %v1409_v31 }
 0x56c   : > { %v1414_v28 = vsel %vm1410_vm7, -3e+38, %v1368_v61  ;;  %v1415_v26 = vsel %vm1411_vm8, -3e+38, %v1369_v62  ;;  %v1416_v32 = vsel %vm1412_vm9, -3e+38, %v1370_v63  ;;  %v1497_v61 = vmax.f32 %v1495_v59, %v1496_v60 }
 0x56d   : > { %v1417_v33 = vsel %vm1413_vm10, -3e+38, %v1371_v3  ;;  %v1418_v34 = vsel %vm543_vm3, %v1414_v28, -inf  ;;  %v1419_v35 = vsel %vm543_vm3, %v1415_v26, -inf  ;;  %v1420_v36 = vsel %vm543_vm3, %v1416_v32, -inf }
 0x56e   : > { %v1421_v39 = vsel %vm543_vm3, %v1417_v33, -inf  ;;  %v1422_v40 = vmax.f32 %v1418_v34, %v1419_v35  ;;  %v1498_v62 = vsub.f32 %v1491_v55, %v1497_v61  ;;  %vm1510_vm3 = vcmask 7168  }
 0x56f   : > { %v1423_v46 = vmax.f32 %v1420_v36, %v1421_v39 }
 0x570   : > { %v1499_v63 = vmul.f32 1.442695, %v1498_v62 }
 0x571   : > { %v1424_v47 = vmax.f32 %v1422_v40, %v1423_v46 }
 0x572   : > { %1761 = vpow2.f32 %v1499_v63 }
 0x573   : > { %v1425_v41 = vrot.slane %v1424_v47, 4 }
 0x575   : > { %v1426_v48 = vmax.f32 %v1424_v47, %v1425_v41 }
 0x577   : > { %v1427_v49 = vrot.slane %v1426_v48, 2 }
 0x579   : > { %v1428_v43 = vmax.f32 %v1426_v48, %v1427_v49 }
 0x57b   : > { %v1429_v45 = vrot.slane %v1428_v43, 1 }
 0x57c   : > { %v1762_v3 = vpop.eup %1761 }
 0x57d   : > { %v1430_v51 = vmax.f32 %v1428_v43, %v1429_v45  ;;  %v1501_v38 = vrot.slane %v1762_v3, 4 }
 0x57f   : > { %v1433_v53 = vmul.f32 %v1432_v50, %v1430_v51  ;;  %v1502_v4 = vadd.f32 %v1762_v3, %v1501_v38 }
 0x581   : > { %v1434_v54 = vadd.f32 %v1433_v53, %v1388_v52  ;;  %v1503_v5 = vrot.slane %v1502_v4, 2 }
 0x583   : > { %1435 = vxpose.xlu0.b32.start.end [1/1] (short) (narrow) %v1434_v54, 8  ;;  %v1504_v9 = vadd.f32 %v1503_v5, %v1502_v4 }
 0x585   : > { %v1505_v37 = vrot.slane %v1504_v9, 1 }
 0x587   : > { %v1506_v10 = vadd.f32 %v1505_v37, %v1504_v9 }
 0x589   : > { %1763 = vrcp.f32 %v1506_v10 }
 0x593   : > { %v1764_v1 = vpop.eup %1763 }
 0x594   : > { %v1508_v11 = vmul.f32 %v1764_v1, %v1762_v3 }
 0x603   : > { %v1451_v0 = vpop.trf.xlu0 }
 0x604   : > { %v1509_v12 = vmul.f32 %v1508_v11, %v1451_v0 }
 0x606   : > { %v1511_v13 = vsel %vm1510_vm3, %v1509_v12, 0.0 }
 0x607   : > { %v1512_v14 = vrot.slane %v1511_v13, 4 }
 0x609   : > { %v1513_v17 = vadd.f32 %v1512_v14, %v1511_v13 }
 0x60b   : > { %v1514_v18 = vrot.slane %v1513_v17, 2 }
 0x60d   : > { %v1515_v2 = vadd.f32 %v1514_v18, %v1513_v17 }
 0x60f   : > { %v1516_v15 = vrot.slane %v1515_v2, 1 }
 0x611   : > { %v1517_v20 = vadd.f32 %v1516_v15, %v1515_v2 }
 0x613   : > { %v1520_v22 = vadd.f32 %v1519_v7, %v1517_v20 }
 0x615   : > { %1522 = vst.msk [vmem:[%s265_s29] sm:$0x1] %vm1521_vm11, %v1520_v22 }
 0x616 PF: > { %p18_p8 = scmp.ge.s32.totalorder %s1961_s25, 4   ;;  %s2555_s15 = smov %s1877_s16 }
 0x617   : > { %s2556_s16 = smov %s1881_s17  ;;  %s2557_s17 = smov %s1985_s6 }
 0x618   : > { %s2558_s18 = smov %s1961_s25  ;;  %20 = sbr.rel (!%p18_p8) target bundleno = 6 (0x6), region = 94 }
 0x61f   :  { %1540 = vsyncpa [#allocation3], 1 }
 0x620   :  { %1542 = vsyncpa [#allocation3 + $0x1], 1 }
 0x621   :  { %1543 = vsyncpa [#allocation6], 1 }
 0x622   :  { %1545 = vsyncpa [#allocation6 + $0x1], 1 }
 0x623   :  { %1546 = vsyncpa [#allocation4], 1 }
 0x624   :  { %1548 = vsyncpa [#allocation4 + $0x1], 1 }

</bundles_post_ra>
